<compile_context>
chip_gen: v6e
topology: v6e:2x2x1
jax: 0.10.0
libtpu: 0.0.40
codegen_flags: <defaults>
</compile_context>

<pallas_src>
import functools

import jax
import jax.numpy as jnp
from jax.experimental import pallas as pl
from jax.experimental.pallas import tpu as pltpu

_LANE = 128
_HALO = 128                          # one lane-block of halo per tile
_MAX_TILE = 512                      # re-derived for v7x (64 MiB VMEM)
_VMEM_LIMIT = 48 * 1024 * 1024       # explicit scoped-VMEM budget


def _round_up(n, m):
    return ((n + m - 1) // m) * m


def _pick_tile(n):
    # lane-dense tile: multiple of 128, capped so double-buffered tiles fit VMEM
    return min(_MAX_TILE, _round_up(max(n, 1), _LANE))


def _stack_taps(a, taps, dilation, width):
    """a: [C, W]; returns [taps*C, width] with tap-major row blocks."""
    if taps == 1:
        return a[:, :width]
    return jnp.concatenate(
        [a[:, k * dilation: k * dilation + width] for k in range(taps)], axis=0)


# ----------------------------------------------------------------------------
# Kernel 1: single conv (used for the polyphase transposed conv), fused leaky
# ----------------------------------------------------------------------------
def _conv_stacked_kernel(x0_ref, x1_ref, w_ref, b_ref, o_ref, *,
                         taps, dilation, tl, act_in, act_out):
    # x0: main L-tile, x1: 128-lane halo block -> window [Cin, tl + 128]
    xw = jnp.concatenate([x0_ref[...], x1_ref[...]], axis=-1)
    if act_in == "leaky":
        xw = jnp.where(xw >= 0, xw, 0.1 * xw)
    xs = _stack_taps(xw.astype(jnp.bfloat16), taps, dilation, tl)   # [K*Cin, tl]
    acc = jnp.dot(w_ref[...], xs, preferred_element_type=jnp.float32)
    acc = acc + b_ref[...]                                          # f32 bias
    if act_out == "leaky":
        acc = jnp.where(acc >= 0, acc, 0.1 * acc)
    elif act_out == "tanh":
        acc = jnp.tanh(acc)
    o_ref[...] = acc.astype(o_ref.dtype)


def fused_conv1d(x, w_packed, b_packed, *, taps, dilation, pad_left,
                 out_len, act_in=None, act_out=None):
    """x: [B, Cin, L]; w_packed: [Cout, taps*Cin] bf16; b_packed: [Cout, 1] f32."""
    B, Cin, L = x.shape
    Cout = w_packed.shape[0]
    assert w_packed.shape[1] == taps * Cin
    halo = dilation * (taps - 1)
    assert halo <= _HALO and pad_left <= _HALO
    tl = _pick_tile(out_len)
    n_t = -(-out_len // tl)
    lp = n_t * tl + _HALO
    rp = lp - pad_left - L
    assert rp >= 0
    xp = jnp.pad(x, ((0, 0), (0, 0), (pad_left, rp)))
    R = tl // _LANE

    kernel = functools.partial(_conv_stacked_kernel, taps=taps, dilation=dilation,
                               tl=tl, act_in=act_in, act_out=act_out)
    out = pl.pallas_call(
        kernel,
        out_shape=jax.ShapeDtypeStruct((B, Cout, n_t * tl), jnp.float32),
        grid=(B, n_t),
        in_specs=[
            pl.BlockSpec((None, Cin, tl), lambda b, l: (b, 0, l)),
            pl.BlockSpec((None, Cin, _HALO), lambda b, l: (b, 0, (l + 1) * R)),
            pl.BlockSpec((Cout, taps * Cin), lambda b, l: (0, 0)),
            pl.BlockSpec((Cout, 1), lambda b, l: (0, 0)),
        ],
        out_specs=pl.BlockSpec((None, Cout, tl), lambda b, l: (b, 0, l)),
        compiler_params=pltpu.CompilerParams(
            dimension_semantics=("parallel", "parallel"),
            vmem_limit_bytes=_VMEM_LIMIT),
    )(xp, xp, w_packed, b_packed)
    return out[:, :, :out_len]


# ----------------------------------------------------------------------------
# Kernel 2: fused ResBlock unit:
#   out = scale * ( x + conv2(leaky(conv1(leaky(x)))) [+ acc] )
# ----------------------------------------------------------------------------
def _res_unit_kernel(*refs, taps, d1, d2, tl, real_len, has_acc, scale):
    if has_acc:
        x0_ref, x1_ref, w1_ref, b1_ref, w2_ref, b2_ref, acc_ref, o_ref = refs
    else:
        x0_ref, x1_ref, w1_ref, b1_ref, w2_ref, b2_ref, o_ref = refs
        acc_ref = None
    pad1 = d1 * (taps - 1) // 2
    pad2 = d2 * (taps - 1) // 2
    mid_w = tl + 2 * pad2                       # conv1 output width needed by conv2

    # main tile + 128-lane halo -> window [C, tl + 128] (covers tl + 2*(pad1+pad2))
    xw = jnp.concatenate([x0_ref[...], x1_ref[...]], axis=-1)     # f32
    a = jnp.where(xw >= 0, xw, 0.1 * xw).astype(jnp.bfloat16)     # LeakyReLU(0.1)

    s1 = _stack_taps(a, taps, d1, mid_w)                          # [K*C, mid_w]
    t1 = jnp.dot(w1_ref[...], s1, preferred_element_type=jnp.float32) + b1_ref[...]
    # intermediate columns outside the real sequence must be exactly zero
    # (conv2's "same" padding pads the *intermediate* with zeros, not conv1(0)).
    col = (pl.program_id(1) * tl - pad2
           + jax.lax.broadcasted_iota(jnp.int32, (1, mid_w), 1))
    t1 = jnp.where((col >= 0) & (col < real_len), t1, 0.0)
    t1 = jnp.where(t1 >= 0, t1, 0.1 * t1).astype(jnp.bfloat16)

    s2 = _stack_taps(t1, taps, d2, tl)                            # [K*C, tl]
    t2 = jnp.dot(w2_ref[...], s2, preferred_element_type=jnp.float32) + b2_ref[...]

    res = xw[:, pad1 + pad2: pad1 + pad2 + tl]                    # pre-activation x
    out = t2 + res
    if has_acc:
        out = out + acc_ref[...]
    if scale != 1.0:
        out = out * scale
    o_ref[...] = out.astype(o_ref.dtype)


def fused_res_unit(x, w1, b1, w2, b2, *, taps, d1, d2, acc=None, scale=1.0):
    B, C, L = x.shape
    assert (taps - 1) % 2 == 0, "MRF kernels are assumed odd ('same' padding)"
    assert w1.shape == (C, taps * C) and w2.shape == (C, taps * C)
    pad1 = d1 * (taps - 1) // 2
    pad2 = d2 * (taps - 1) // 2
    PL = pad1 + pad2
    assert 2 * PL <= _HALO
    tl = _pick_tile(L)
    n_t = -(-L // tl)
    lp = n_t * tl + _HALO
    xp = jnp.pad(x, ((0, 0), (0, 0), (PL, lp - PL - L)))
    R = tl // _LANE

    args = [xp, xp, w1, b1, w2, b2]
    in_specs = [
        pl.BlockSpec((None, C, tl), lambda b, l: (b, 0, l)),
        pl.BlockSpec((None, C, _HALO), lambda b, l: (b, 0, (l + 1) * R)),
        pl.BlockSpec((C, taps * C), lambda b, l: (0, 0)),
        pl.BlockSpec((C, 1), lambda b, l: (0, 0)),
        pl.BlockSpec((C, taps * C), lambda b, l: (0, 0)),
        pl.BlockSpec((C, 1), lambda b, l: (0, 0)),
    ]
    if acc is not None:
        accp = jnp.pad(acc, ((0, 0), (0, 0), (0, n_t * tl - L)))
        args.append(accp)
        in_specs.append(pl.BlockSpec((None, C, tl), lambda b, l: (b, 0, l)))

    kernel = functools.partial(_res_unit_kernel, taps=taps, d1=d1, d2=d2, tl=tl,
                               real_len=L, has_acc=acc is not None, scale=scale)
    out = pl.pallas_call(
        kernel,
        out_shape=jax.ShapeDtypeStruct((B, C, n_t * tl), jnp.float32),
        grid=(B, n_t),
        in_specs=in_specs,
        out_specs=pl.BlockSpec((None, C, tl), lambda b, l: (b, 0, l)),
        compiler_params=pltpu.CompilerParams(
            dimension_semantics=("parallel", "parallel"),
            vmem_limit_bytes=_VMEM_LIMIT),
    )(*args)
    return out[:, :, :L]


# ----------------------------------------------------------------------------
# One-time weight packing (hoist transposes/flips out of the hot path)
# ----------------------------------------------------------------------------
def pack_conv1d(w, b):
    """PyTorch Conv1d weight [Cout, Cin, K] -> [Cout, K*Cin] bf16, bias [Cout,1] f32."""
    Cout, Cin, K = w.shape
    wp = jnp.transpose(w, (0, 2, 1)).reshape(Cout, K * Cin).astype(jnp.bfloat16)
    return wp, b.reshape(Cout, 1).astype(jnp.float32)


def pack_conv_transpose_polyphase(w_t, b, stride, padding):
    """PyTorch ConvTranspose1d weight [Cin, Cout, K] -> polyphase conv filter.

    Returns W [S*Cout, J*Cin] bf16, bias [S*Cout, 1] f32, and meta {J, A}.
    Phase s (= output position t mod S) occupies rows [s*Cout, (s+1)*Cout).
    """
    Cin, Cout, K = w_t.shape
    S, P = stride, padding
    phases = []
    for r in range(S):
        ks = list(range(r, K, S))
        t0 = (r - P) % S
        q0 = (t0 + P) // S
        phases.append((ks, t0, q0))
    A = max(0, max(len(ks) - 1 - q0 for ks, _, q0 in phases))
    Bo = max(q0 for _, _, q0 in phases)
    J = A + Bo + 1
    h = jnp.zeros((S, Cout, Cin, J), jnp.float32)
    for ks, t0, q0 in phases:
        for jpp in range(len(ks)):
            j = q0 + A - jpp
            h = h.at[t0, :, :, j].set(jnp.transpose(w_t[:, :, ks[jpp]], (1, 0)))
    w_packed = h.transpose(0, 1, 3, 2).reshape(S * Cout, J * Cin).astype(jnp.bfloat16)
    b_packed = jnp.tile(b, (S,)).reshape(S * Cout, 1).astype(jnp.float32)
    return w_packed, b_packed, {"J": J, "A": A}


# ----------------------------------------------------------------------------
# Parameter init (PyTorch layouts) and GeneratorBlock forward
# ----------------------------------------------------------------------------
def _init_conv(key, cin, cout, k, scale=0.1):
    kw, kb = jax.random.split(key)
    return {"w": scale * jax.random.normal(kw, (cout, cin, k), jnp.float32),
            "b": scale * jax.random.normal(kb, (cout,), jnp.float32)}


def _init_conv_t(key, cin, cout, k, scale=0.1):
    kw, kb = jax.random.split(key)
    return {"w": scale * jax.random.normal(kw, (cin, cout, k), jnp.float32),
            "b": scale * jax.random.normal(kb, (cout,), jnp.float32)}


def init_generator_block_params(key, in_ch, out_ch, kernel_size,
                                mrf_kernels, mrf_dilation):
    n_units = sum(len(d) for d in mrf_dilation)
    keys = jax.random.split(key, 1 + 2 * n_units)
    raw = {"up": _init_conv_t(keys[0], in_ch, out_ch, kernel_size), "res": []}
    idx = 1
    for j, mk in enumerate(mrf_kernels):
        units = []
        for _ in mrf_dilation[j]:
            units.append({"c1": _init_conv(keys[idx], out_ch, out_ch, mk),
                          "c2": _init_conv(keys[idx + 1], out_ch, out_ch, mk)})
            idx += 2
        raw["res"].append(units)
    return raw


def make_generator_block_fn(raw, *, kernel_size, mrf_kernels, mrf_dilation):
    S = kernel_size // 2
    P = (kernel_size - S) // 2
    cout = raw["up"]["w"].shape[1]

    up_w, up_b, meta_up = pack_conv_transpose_polyphase(
        raw["up"]["w"], raw["up"]["b"], S, P)
    packed = {"up_w": up_w, "up_b": up_b, "res": []}
    for j in range(len(mrf_kernels)):
        units = []
        for unit in raw["res"][j]:
            w1, b1 = pack_conv1d(unit["c1"]["w"], unit["c1"]["b"])
            w2, b2 = pack_conv1d(unit["c2"]["w"], unit["c2"]["b"])
            units.append({"w1": w1, "b1": b1, "w2": w2, "b2": b2})
        packed["res"].append(units)

    n_res = len(mrf_kernels)

    def forward(params, x):
        B, _, L = x.shape
        T_out = (L - 1) * S - 2 * P + kernel_size
        M = -(-T_out // S)
        # LeakyReLU(0.1) fused into the polyphase transposed-conv kernel
        y = fused_conv1d(x, params["up_w"], params["up_b"],
                         taps=meta_up["J"], dilation=1, pad_left=meta_up["A"],
                         out_len=M, act_in="leaky")
        # interleave phases -> time axis (pure layout op, kept in XLA so the
        # pallas output stays lane-dense [S*Cout, tl])
        y = (y.reshape(B, S, cout, M).transpose(0, 2, 3, 1)
               .reshape(B, cout, M * S)[:, :, :T_out])

        # MRF: running sum and final 1/n mean are folded into kernel epilogues
        acc = None
        for j, mk in enumerate(mrf_kernels):
            h = y
            dl = mrf_dilation[j]
            for u, (d1, d2) in enumerate(dl):
                last = u == len(dl) - 1
                unit = params["res"][j][u]
                h = fused_res_unit(
                    h, unit["w1"], unit["b1"], unit["w2"], unit["b2"],
                    taps=mk, d1=d1, d2=d2,
                    acc=(acc if last else None),
                    scale=(1.0 / n_res) if (last and j == n_res - 1) else 1.0)
            acc = h
        return acc

    return packed, jax.jit(forward)


# ----------------------------------------------------------------------------
# Pure-JAX reference (same bf16-operand / f32-accumulate numerics)
# ----------------------------------------------------------------------------
def _leaky(x):
    return jnp.where(x >= 0, x, 0.1 * x)


def _ref_conv1d(x, w, b, dilation):
    B, Cin, L = x.shape
    Cout, _, K = w.shape
    pad = dilation * (K - 1) // 2
    xp = jnp.pad(x, ((0, 0), (0, 0), (pad, pad))).astype(jnp.bfloat16)
    wb = w.astype(jnp.bfloat16)
    acc = jnp.zeros((B, Cout, L), jnp.float32)
    for k in range(K):
        acc = acc + jnp.einsum("oi,bil->bol", wb[:, :, k],
                               xp[:, :, k * dilation: k * dilation + L],
                               preferred_element_type=jnp.float32)
    return acc + b[None, :, None]


def _ref_conv_transpose1d(x, w_t, bias, stride, padding):
    B, Cin, L = x.shape
    _, Cout, K = w_t.shape
    T = (L - 1) * stride - 2 * padding + K
    full = (L - 1) * stride + K
    xb = x.astype(jnp.bfloat16)
    wb = w_t.astype(jnp.bfloat16)
    y = jnp.zeros((B, Cout, full), jnp.float32)
    for k in range(K):
        contrib = jnp.einsum("io,bil->bol", wb[:, :, k], xb,
                             preferred_element_type=jnp.float32)
        y = y.at[:, :, k: k + (L - 1) * stride + 1: stride].add(contrib)
    return y[:, :, padding: padding + T] + bias[None, :, None]


def ref_generator_block(raw, x, *, kernel_size, mrf_kernels, mrf_dilation):
    S = kernel_size // 2
    P = (kernel_size - S) // 2
    h = _ref_conv_transpose1d(_leaky(x), raw["up"]["w"], raw["up"]["b"], S, P)
    acc = None
    for j, mk in enumerate(mrf_kernels):
        r = h
        for unit, (d1, d2) in zip(raw["res"][j], mrf_dilation[j]):
            t = _ref_conv1d(_leaky(r), unit["c1"]["w"], unit["c1"]["b"], d1)
            t = _ref_conv1d(_leaky(t), unit["c2"]["w"], unit["c2"]["b"], d2)
            r = r + t
        acc = r if acc is None else acc + r
    return acc / float(len(mrf_kernels))


# ----------------------------------------------------------------------------
# Demo
# ----------------------------------------------------------------------------
if __name__ == "__main__":
    in_channels, out_channels = 32, 16
    kernel_size = 4                                  # stride 2, padding 1 (2x upsample)
    mrf_kernels = [3, 7]
    mrf_dilation = [[[1, 1], [3, 1]], [[1, 1], [3, 1]]]
    B, L = 2, 16

    key = jax.random.PRNGKey(0)
    k_par, k_x = jax.random.split(key)
    raw = init_generator_block_params(k_par, in_channels, out_channels,
                                      kernel_size, mrf_kernels, mrf_dilation)
    x = jax.random.normal(k_x, (B, in_channels, L), jnp.float32)

    packed, fwd = make_generator_block_fn(
        raw, kernel_size=kernel_size, mrf_kernels=mrf_kernels,
        mrf_dilation=mrf_dilation)

    out = jax.block_until_ready(fwd(packed, x))

    S = kernel_size // 2
    P = (kernel_size - S) // 2
    T_out = (L - 1) * S - 2 * P + kernel_size
    assert out.shape == (B, out_channels, T_out), out.shape
    assert bool(jnp.all(jnp.isfinite(out)))

    ref = ref_generator_block(raw, x, kernel_size=kernel_size,
                              mrf_kernels=mrf_kernels, mrf_dilation=mrf_dilation)
    assert bool(jnp.allclose(out, ref, atol=1e-2, rtol=1e-2)), \
        float(jnp.max(jnp.abs(out - ref)))
    print("KERNEL_OK")
</pallas_src>

<mosaic_0001>
module attributes {stable_mosaic.version = 11 : i64} {
  func.func @_conv_stacked_kernel(%arg0: i32, %arg1: i32, %arg2: memref<1x32x128xf32, #tpu.memory_space<vmem>>, %arg3: memref<1x32x128xf32, #tpu.memory_space<vmem>>, %arg4: memref<32x96xbf16, #tpu.memory_space<vmem>>, %arg5: memref<32x1xf32, #tpu.memory_space<vmem>>, %arg6: memref<1x32x128xf32, #tpu.memory_space<vmem>>) attributes {dimension_semantics = [#tpu.dimension_semantics<parallel>, #tpu.dimension_semantics<parallel>], iteration_bounds = array<i64: 2, 1>, scalar_prefetch = 0 : i64, scratch_operands = 0 : i64, tpu.core_type = #tpu.core_type<tc>, window_params = [{transform_indices = @transform_0, window_bounds = array<i64: 1, 32, 128>}, {transform_indices = @transform_1, window_bounds = array<i64: 1, 32, 128>}, {pipeline_mode = #tpu.pipeline_mode<synchronous>, transform_indices = @transform_2, window_bounds = array<i64: 32, 96>}, {pipeline_mode = #tpu.pipeline_mode<synchronous>, transform_indices = @transform_3, window_bounds = array<i64: 32, 1>}, {transform_indices = @transform_4, window_bounds = array<i64: 1, 32, 128>}]} {
    %c0 = arith.constant 0 : index
    %c0_0 = arith.constant 0 : index
    %c0_1 = arith.constant 0 : index
    %0 = vector.load %arg2[%c0, %c0_0, %c0_1] : memref<1x32x128xf32, #tpu.memory_space<vmem>>, vector<1x32x128xf32>
    %1 = vector.shape_cast %0 : vector<1x32x128xf32> to vector<32x128xf32>
    %c0_2 = arith.constant 0 : index
    %c0_3 = arith.constant 0 : index
    %c0_4 = arith.constant 0 : index
    %2 = vector.load %arg3[%c0_2, %c0_3, %c0_4] : memref<1x32x128xf32, #tpu.memory_space<vmem>>, vector<1x32x128xf32>
    %3 = vector.shape_cast %2 : vector<1x32x128xf32> to vector<32x128xf32>
    %4 = tpu.concatenate %1, %3 in 1 : vector<32x128xf32>, vector<32x128xf32> -> vector<32x256xf32>
    %cst = arith.constant 0.000000e+00 : f32
    %5 = vector.broadcast %cst : f32 to vector<32x256xf32>
    %6 = arith.cmpf oge, %4, %5 : vector<32x256xf32>
    %cst_5 = arith.constant 1.000000e-01 : f32
    %7 = vector.broadcast %cst_5 : f32 to vector<32x256xf32>
    %8 = arith.mulf %7, %4 : vector<32x256xf32>
    %9 = arith.select %6, %4, %8 : vector<32x256xi1>, vector<32x256xf32>
    %10 = arith.truncf %9 : vector<32x256xf32> to vector<32x256xbf16>
    %11 = vector.extract_strided_slice %10 {offsets = [0, 0], sizes = [32, 128], strides = [1, 1]} : vector<32x256xbf16> to vector<32x128xbf16>
    %12 = vector.extract_strided_slice %10 {offsets = [0, 1], sizes = [32, 128], strides = [1, 1]} : vector<32x256xbf16> to vector<32x128xbf16>
    %13 = vector.extract_strided_slice %10 {offsets = [0, 2], sizes = [32, 128], strides = [1, 1]} : vector<32x256xbf16> to vector<32x128xbf16>
    %14 = tpu.concatenate %11, %12, %13 in 0 : vector<32x128xbf16>, vector<32x128xbf16>, vector<32x128xbf16> -> vector<96x128xbf16>
    %c0_6 = arith.constant 0 : index
    %c0_7 = arith.constant 0 : index
    %15 = vector.load %arg4[%c0_6, %c0_7] : memref<32x96xbf16, #tpu.memory_space<vmem>>, vector<32x96xbf16>
    %cst_8 = arith.constant dense<0.000000e+00> : vector<32x128xf32>
    %16 = tpu.matmul %15, %14, %cst_8 {dimension_numbers = #tpu.dot_dimension_numbers<[1], [0], [0], [1], [0, 0, 1, 1], [], []>} : vector<32x96xbf16>, vector<96x128xbf16>, vector<32x128xf32> -> vector<32x128xf32>
    %c0_9 = arith.constant 0 : index
    %c0_10 = arith.constant 0 : index
    %17 = vector.load %arg5[%c0_9, %c0_10] : memref<32x1xf32, #tpu.memory_space<vmem>>, vector<32x1xf32>
    %18 = vector.broadcast %17 : vector<32x1xf32> to vector<32x128xf32>
    %19 = arith.addf %16, %18 : vector<32x128xf32>
    %c0_11 = arith.constant 0 : index
    %c0_12 = arith.constant 0 : index
    %c0_13 = arith.constant 0 : index
    %20 = vector.load %arg6[%c0_11, %c0_12, %c0_13] : memref<1x32x128xf32, #tpu.memory_space<vmem>>, vector<1x32x128xf32>
    %21 = vector.shape_cast %20 : vector<1x32x128xf32> to vector<32x128xf32>
    %22 = vector.shape_cast %19 : vector<32x128xf32> to vector<1x32x128xf32>
    tpu.vector_store %arg6[%c0_11, %c0_12, %c0_13], %22 {strides = array<i32>} : memref<1x32x128xf32, #tpu.memory_space<vmem>>, vector<1x32x128xf32>,
    return
  }
  func.func @transform_0(%arg0: i32, %arg1: i32) -> (i32, i32, i32) {
    %c0_i32 = arith.constant 0 : i32
    %c0_i32_0 = arith.constant 0 : i32
    return %arg0, %c0_i32, %arg1 : i32, i32, i32
  }
  func.func @transform_1(%arg0: i32, %arg1: i32) -> (i32, i32, i32) {
    %c1_i32 = arith.constant 1 : i32
    %0 = arith.addi %arg1, %c1_i32 : i32
    %c1_i32_0 = arith.constant 1 : i32
    %1 = arith.muli %0, %c1_i32_0 : i32
    %c0_i32 = arith.constant 0 : i32
    %c0_i32_1 = arith.constant 0 : i32
    return %arg0, %c0_i32, %1 : i32, i32, i32
  }
  func.func @transform_2(%arg0: i32, %arg1: i32) -> (i32, i32) {
    %c0_i32 = arith.constant 0 : i32
    %c0_i32_0 = arith.constant 0 : i32
    %c0_i32_1 = arith.constant 0 : i32
    return %c0_i32, %c0_i32_0 : i32, i32
  }
  func.func @transform_3(%arg0: i32, %arg1: i32) -> (i32, i32) {
    %c0_i32 = arith.constant 0 : i32
    %c0_i32_0 = arith.constant 0 : i32
    %c0_i32_1 = arith.constant 0 : i32
    return %c0_i32, %c0_i32_0 : i32, i32
  }
  func.func @transform_4(%arg0: i32, %arg1: i32) -> (i32, i32, i32) {
    %c0_i32 = arith.constant 0 : i32
    %c0_i32_0 = arith.constant 0 : i32
    return %arg0, %c0_i32, %arg1 : i32, i32, i32
  }
}

module attributes {stable_mosaic.version = 11 : i64} {
  func.func @_res_unit_kernel(%arg0: i32, %arg1: i32, %arg2: memref<1x16x128xf32, #tpu.memory_space<vmem>>, %arg3: memref<1x16x128xf32, #tpu.memory_space<vmem>>, %arg4: memref<16x48xbf16, #tpu.memory_space<vmem>>, %arg5: memref<16x1xf32, #tpu.memory_space<vmem>>, %arg6: memref<16x48xbf16, #tpu.memory_space<vmem>>, %arg7: memref<16x1xf32, #tpu.memory_space<vmem>>, %arg8: memref<1x16x128xf32, #tpu.memory_space<vmem>>) attributes {dimension_semantics = [#tpu.dimension_semantics<parallel>, #tpu.dimension_semantics<parallel>], iteration_bounds = array<i64: 2, 1>, scalar_prefetch = 0 : i64, scratch_operands = 0 : i64, tpu.core_type = #tpu.core_type<tc>, window_params = [{transform_indices = @transform_0, window_bounds = array<i64: 1, 16, 128>}, {transform_indices = @transform_1, window_bounds = array<i64: 1, 16, 128>}, {pipeline_mode = #tpu.pipeline_mode<synchronous>, transform_indices = @transform_2, window_bounds = array<i64: 16, 48>}, {pipeline_mode = #tpu.pipeline_mode<synchronous>, transform_indices = @transform_3, window_bounds = array<i64: 16, 1>}, {pipeline_mode = #tpu.pipeline_mode<synchronous>, transform_indices = @transform_4, window_bounds = array<i64: 16, 48>}, {pipeline_mode = #tpu.pipeline_mode<synchronous>, transform_indices = @transform_5, window_bounds = array<i64: 16, 1>}, {transform_indices = @transform_6, window_bounds = array<i64: 1, 16, 128>}]} {
    %c0 = arith.constant 0 : index
    %c0_0 = arith.constant 0 : index
    %c0_1 = arith.constant 0 : index
    %0 = vector.load %arg2[%c0, %c0_0, %c0_1] : memref<1x16x128xf32, #tpu.memory_space<vmem>>, vector<1x16x128xf32>
    %1 = vector.shape_cast %0 : vector<1x16x128xf32> to vector<16x128xf32>
    %c0_2 = arith.constant 0 : index
    %c0_3 = arith.constant 0 : index
    %c0_4 = arith.constant 0 : index
    %2 = vector.load %arg3[%c0_2, %c0_3, %c0_4] : memref<1x16x128xf32, #tpu.memory_space<vmem>>, vector<1x16x128xf32>
    %3 = vector.shape_cast %2 : vector<1x16x128xf32> to vector<16x128xf32>
    %4 = tpu.concatenate %1, %3 in 1 : vector<16x128xf32>, vector<16x128xf32> -> vector<16x256xf32>
    %cst = arith.constant 0.000000e+00 : f32
    %5 = vector.broadcast %cst : f32 to vector<16x256xf32>
    %6 = arith.cmpf oge, %4, %5 : vector<16x256xf32>
    %cst_5 = arith.constant 1.000000e-01 : f32
    %7 = vector.broadcast %cst_5 : f32 to vector<16x256xf32>
    %8 = arith.mulf %7, %4 : vector<16x256xf32>
    %9 = arith.select %6, %4, %8 : vector<16x256xi1>, vector<16x256xf32>
    %10 = arith.truncf %9 : vector<16x256xf32> to vector<16x256xbf16>
    %11 = vector.extract_strided_slice %10 {offsets = [0, 0], sizes = [16, 130], strides = [1, 1]} : vector<16x256xbf16> to vector<16x130xbf16>
    %12 = vector.extract_strided_slice %10 {offsets = [0, 1], sizes = [16, 130], strides = [1, 1]} : vector<16x256xbf16> to vector<16x130xbf16>
    %13 = vector.extract_strided_slice %10 {offsets = [0, 2], sizes = [16, 130], strides = [1, 1]} : vector<16x256xbf16> to vector<16x130xbf16>
    %14 = tpu.concatenate %11, %12, %13 in 0 : vector<16x130xbf16>, vector<16x130xbf16>, vector<16x130xbf16> -> vector<48x130xbf16>
    %c0_6 = arith.constant 0 : index
    %c0_7 = arith.constant 0 : index
    %15 = vector.load %arg4[%c0_6, %c0_7] : memref<16x48xbf16, #tpu.memory_space<vmem>>, vector<16x48xbf16>
    %cst_8 = arith.constant dense<0.000000e+00> : vector<16x130xf32>
    %16 = tpu.matmul %15, %14, %cst_8 {dimension_numbers = #tpu.dot_dimension_numbers<[1], [0], [0], [1], [0, 0, 1, 1], [], []>} : vector<16x48xbf16>, vector<48x130xbf16>, vector<16x130xf32> -> vector<16x130xf32>
    %c0_9 = arith.constant 0 : index
    %c0_10 = arith.constant 0 : index
    %17 = vector.load %arg5[%c0_9, %c0_10] : memref<16x1xf32, #tpu.memory_space<vmem>>, vector<16x1xf32>
    %18 = vector.broadcast %17 : vector<16x1xf32> to vector<16x130xf32>
    %19 = arith.addf %16, %18 : vector<16x130xf32>
    %c128_i32 = arith.constant 128 : i32
    %20 = arith.muli %arg1, %c128_i32 : i32
    %c1_i32 = arith.constant 1 : i32
    %21 = arith.subi %20, %c1_i32 : i32
    %22 = tpu.iota {dimensions = array<i32: 1>} : vector<1x130xi32>
    %23 = vector.broadcast %21 : i32 to vector<1x130xi32>
    %24 = arith.addi %23, %22 : vector<1x130xi32>
    %c0_i32 = arith.constant 0 : i32
    %25 = vector.broadcast %c0_i32 : i32 to vector<1x130xi32>
    %26 = arith.cmpi sge, %24, %25 : vector<1x130xi32>
    %c32_i32 = arith.constant 32 : i32
    %27 = vector.broadcast %c32_i32 : i32 to vector<1x130xi32>
    %28 = arith.cmpi slt, %24, %27 : vector<1x130xi32>
    %29 = arith.andi %26, %28 : vector<1x130xi1>
    %cst_11 = arith.constant 0.000000e+00 : f32
    %30 = vector.shape_cast %29 : vector<1x130xi1> to vector<1x130xi1>
    %31 = vector.broadcast %30 : vector<1x130xi1> to vector<16x130xi1>
    %32 = vector.broadcast %cst_11 : f32 to vector<16x130xf32>
    %33 = arith.select %31, %19, %32 : vector<16x130xi1>, vector<16x130xf32>
    %cst_12 = arith.constant 0.000000e+00 : f32
    %34 = vector.broadcast %cst_12 : f32 to vector<16x130xf32>
    %35 = arith.cmpf oge, %33, %34 : vector<16x130xf32>
    %cst_13 = arith.constant 1.000000e-01 : f32
    %36 = vector.broadcast %cst_13 : f32 to vector<16x130xf32>
    %37 = arith.mulf %36, %33 : vector<16x130xf32>
    %38 = arith.select %35, %33, %37 : vector<16x130xi1>, vector<16x130xf32>
    %39 = arith.truncf %38 : vector<16x130xf32> to vector<16x130xbf16>
    %40 = vector.extract_strided_slice %39 {offsets = [0, 0], sizes = [16, 128], strides = [1, 1]} : vector<16x130xbf16> to vector<16x128xbf16>
    %41 = vector.extract_strided_slice %39 {offsets = [0, 1], sizes = [16, 128], strides = [1, 1]} : vector<16x130xbf16> to vector<16x128xbf16>
    %42 = vector.extract_strided_slice %39 {offsets = [0, 2], sizes = [16, 128], strides = [1, 1]} : vector<16x130xbf16> to vector<16x128xbf16>
    %43 = tpu.concatenate %40, %41, %42 in 0 : vector<16x128xbf16>, vector<16x128xbf16>, vector<16x128xbf16> -> vector<48x128xbf16>
    %c0_14 = arith.constant 0 : index
    %c0_15 = arith.constant 0 : index
    %44 = vector.load %arg6[%c0_14, %c0_15] : memref<16x48xbf16, #tpu.memory_space<vmem>>, vector<16x48xbf16>
    %cst_16 = arith.constant dense<0.000000e+00> : vector<16x128xf32>
    %45 = tpu.matmul %44, %43, %cst_16 {dimension_numbers = #tpu.dot_dimension_numbers<[1], [0], [0], [1], [0, 0, 1, 1], [], []>} : vector<16x48xbf16>, vector<48x128xbf16>, vector<16x128xf32> -> vector<16x128xf32>
    %c0_17 = arith.constant 0 : index
    %c0_18 = arith.constant 0 : index
    %46 = vector.load %arg7[%c0_17, %c0_18] : memref<16x1xf32, #tpu.memory_space<vmem>>, vector<16x1xf32>
    %47 = vector.broadcast %46 : vector<16x1xf32> to vector<16x128xf32>
    %48 = arith.addf %45, %47 : vector<16x128xf32>
    %49 = vector.extract_strided_slice %4 {offsets = [0, 2], sizes = [16, 128], strides = [1, 1]} : vector<16x256xf32> to vector<16x128xf32>
    %50 = arith.addf %48, %49 : vector<16x128xf32>
    %c0_19 = arith.constant 0 : index
    %c0_20 = arith.constant 0 : index
    %c0_21 = arith.constant 0 : index
    %51 = vector.load %arg8[%c0_19, %c0_20, %c0_21] : memref<1x16x128xf32, #tpu.memory_space<vmem>>, vector<1x16x128xf32>
    %52 = vector.shape_cast %51 : vector<1x16x128xf32> to vector<16x128xf32>
    %53 = vector.shape_cast %50 : vector<16x128xf32> to vector<1x16x128xf32>
    tpu.vector_store %arg8[%c0_19, %c0_20, %c0_21], %53 {strides = array<i32>} : memref<1x16x128xf32, #tpu.memory_space<vmem>>, vector<1x16x128xf32>,
    return
  }
  func.func @transform_0(%arg0: i32, %arg1: i32) -> (i32, i32, i32) {
    %c0_i32 = arith.constant 0 : i32
    %c0_i32_0 = arith.constant 0 : i32
    return %arg0, %c0_i32, %arg1 : i32, i32, i32
  }
  func.func @transform_1(%arg0: i32, %arg1: i32) -> (i32, i32, i32) {
    %c1_i32 = arith.constant 1 : i32
    %0 = arith.addi %arg1, %c1_i32 : i32
    %c1_i32_0 = arith.constant 1 : i32
    %1 = arith.muli %0, %c1_i32_0 : i32
    %c0_i32 = arith.constant 0 : i32
    %c0_i32_1 = arith.constant 0 : i32
    return %arg0, %c0_i32, %1 : i32, i32, i32
  }
  func.func @transform_2(%arg0: i32, %arg1: i32) -> (i32, i32) {
    %c0_i32 = arith.constant 0 : i32
    %c0_i32_0 = arith.constant 0 : i32
    %c0_i32_1 = arith.constant 0 : i32
    return %c0_i32, %c0_i32_0 : i32, i32
  }
  func.func @transform_3(%arg0: i32, %arg1: i32) -> (i32, i32) {
    %c0_i32 = arith.constant 0 : i32
    %c0_i32_0 = arith.constant 0 : i32
    %c0_i32_1 = arith.constant 0 : i32
    return %c0_i32, %c0_i32_0 : i32, i32
  }
  func.func @transform_4(%arg0: i32, %arg1: i32) -> (i32, i32) {
    %c0_i32 = arith.constant 0 : i32
    %c0_i32_0 = arith.constant 0 : i32
    %c0_i32_1 = arith.constant 0 : i32
    return %c0_i32, %c0_i32_0 : i32, i32
  }
  func.func @transform_5(%arg0: i32, %arg1: i32) -> (i32, i32) {
    %c0_i32 = arith.constant 0 : i32
    %c0_i32_0 = arith.constant 0 : i32
    %c0_i32_1 = arith.constant 0 : i32
    return %c0_i32, %c0_i32_0 : i32, i32
  }
  func.func @transform_6(%arg0: i32, %arg1: i32) -> (i32, i32, i32) {
    %c0_i32 = arith.constant 0 : i32
    %c0_i32_0 = arith.constant 0 : i32
    return %arg0, %c0_i32, %arg1 : i32, i32, i32
  }
}

module attributes {stable_mosaic.version = 11 : i64} {
  func.func @_res_unit_kernel(%arg0: i32, %arg1: i32, %arg2: memref<1x16x128xf32, #tpu.memory_space<vmem>>, %arg3: memref<1x16x128xf32, #tpu.memory_space<vmem>>, %arg4: memref<16x48xbf16, #tpu.memory_space<vmem>>, %arg5: memref<16x1xf32, #tpu.memory_space<vmem>>, %arg6: memref<16x48xbf16, #tpu.memory_space<vmem>>, %arg7: memref<16x1xf32, #tpu.memory_space<vmem>>, %arg8: memref<1x16x128xf32, #tpu.memory_space<vmem>>) attributes {dimension_semantics = [#tpu.dimension_semantics<parallel>, #tpu.dimension_semantics<parallel>], iteration_bounds = array<i64: 2, 1>, scalar_prefetch = 0 : i64, scratch_operands = 0 : i64, tpu.core_type = #tpu.core_type<tc>, window_params = [{transform_indices = @transform_0, window_bounds = array<i64: 1, 16, 128>}, {transform_indices = @transform_1, window_bounds = array<i64: 1, 16, 128>}, {pipeline_mode = #tpu.pipeline_mode<synchronous>, transform_indices = @transform_2, window_bounds = array<i64: 16, 48>}, {pipeline_mode = #tpu.pipeline_mode<synchronous>, transform_indices = @transform_3, window_bounds = array<i64: 16, 1>}, {pipeline_mode = #tpu.pipeline_mode<synchronous>, transform_indices = @transform_4, window_bounds = array<i64: 16, 48>}, {pipeline_mode = #tpu.pipeline_mode<synchronous>, transform_indices = @transform_5, window_bounds = array<i64: 16, 1>}, {transform_indices = @transform_6, window_bounds = array<i64: 1, 16, 128>}]} {
    %c0 = arith.constant 0 : index
    %c0_0 = arith.constant 0 : index
    %c0_1 = arith.constant 0 : index
    %0 = vector.load %arg2[%c0, %c0_0, %c0_1] : memref<1x16x128xf32, #tpu.memory_space<vmem>>, vector<1x16x128xf32>
    %1 = vector.shape_cast %0 : vector<1x16x128xf32> to vector<16x128xf32>
    %c0_2 = arith.constant 0 : index
    %c0_3 = arith.constant 0 : index
    %c0_4 = arith.constant 0 : index
    %2 = vector.load %arg3[%c0_2, %c0_3, %c0_4] : memref<1x16x128xf32, #tpu.memory_space<vmem>>, vector<1x16x128xf32>
    %3 = vector.shape_cast %2 : vector<1x16x128xf32> to vector<16x128xf32>
    %4 = tpu.concatenate %1, %3 in 1 : vector<16x128xf32>, vector<16x128xf32> -> vector<16x256xf32>
    %cst = arith.constant 0.000000e+00 : f32
    %5 = vector.broadcast %cst : f32 to vector<16x256xf32>
    %6 = arith.cmpf oge, %4, %5 : vector<16x256xf32>
    %cst_5 = arith.constant 1.000000e-01 : f32
    %7 = vector.broadcast %cst_5 : f32 to vector<16x256xf32>
    %8 = arith.mulf %7, %4 : vector<16x256xf32>
    %9 = arith.select %6, %4, %8 : vector<16x256xi1>, vector<16x256xf32>
    %10 = arith.truncf %9 : vector<16x256xf32> to vector<16x256xbf16>
    %11 = vector.extract_strided_slice %10 {offsets = [0, 0], sizes = [16, 130], strides = [1, 1]} : vector<16x256xbf16> to vector<16x130xbf16>
    %12 = vector.extract_strided_slice %10 {offsets = [0, 3], sizes = [16, 130], strides = [1, 1]} : vector<16x256xbf16> to vector<16x130xbf16>
    %13 = vector.extract_strided_slice %10 {offsets = [0, 6], sizes = [16, 130], strides = [1, 1]} : vector<16x256xbf16> to vector<16x130xbf16>
    %14 = tpu.concatenate %11, %12, %13 in 0 : vector<16x130xbf16>, vector<16x130xbf16>, vector<16x130xbf16> -> vector<48x130xbf16>
    %c0_6 = arith.constant 0 : index
    %c0_7 = arith.constant 0 : index
    %15 = vector.load %arg4[%c0_6, %c0_7] : memref<16x48xbf16, #tpu.memory_space<vmem>>, vector<16x48xbf16>
    %cst_8 = arith.constant dense<0.000000e+00> : vector<16x130xf32>
    %16 = tpu.matmul %15, %14, %cst_8 {dimension_numbers = #tpu.dot_dimension_numbers<[1], [0], [0], [1], [0, 0, 1, 1], [], []>} : vector<16x48xbf16>, vector<48x130xbf16>, vector<16x130xf32> -> vector<16x130xf32>
    %c0_9 = arith.constant 0 : index
    %c0_10 = arith.constant 0 : index
    %17 = vector.load %arg5[%c0_9, %c0_10] : memref<16x1xf32, #tpu.memory_space<vmem>>, vector<16x1xf32>
    %18 = vector.broadcast %17 : vector<16x1xf32> to vector<16x130xf32>
    %19 = arith.addf %16, %18 : vector<16x130xf32>
    %c128_i32 = arith.constant 128 : i32
    %20 = arith.muli %arg1, %c128_i32 : i32
    %c1_i32 = arith.constant 1 : i32
    %21 = arith.subi %20, %c1_i32 : i32
    %22 = tpu.iota {dimensions = array<i32: 1>} : vector<1x130xi32>
    %23 = vector.broadcast %21 : i32 to vector<1x130xi32>
    %24 = arith.addi %23, %22 : vector<1x130xi32>
    %c0_i32 = arith.constant 0 : i32
    %25 = vector.broadcast %c0_i32 : i32 to vector<1x130xi32>
    %26 = arith.cmpi sge, %24, %25 : vector<1x130xi32>
    %c32_i32 = arith.constant 32 : i32
    %27 = vector.broadcast %c32_i32 : i32 to vector<1x130xi32>
    %28 = arith.cmpi slt, %24, %27 : vector<1x130xi32>
    %29 = arith.andi %26, %28 : vector<1x130xi1>
    %cst_11 = arith.constant 0.000000e+00 : f32
    %30 = vector.shape_cast %29 : vector<1x130xi1> to vector<1x130xi1>
    %31 = vector.broadcast %30 : vector<1x130xi1> to vector<16x130xi1>
    %32 = vector.broadcast %cst_11 : f32 to vector<16x130xf32>
    %33 = arith.select %31, %19, %32 : vector<16x130xi1>, vector<16x130xf32>
    %cst_12 = arith.constant 0.000000e+00 : f32
    %34 = vector.broadcast %cst_12 : f32 to vector<16x130xf32>
    %35 = arith.cmpf oge, %33, %34 : vector<16x130xf32>
    %cst_13 = arith.constant 1.000000e-01 : f32
    %36 = vector.broadcast %cst_13 : f32 to vector<16x130xf32>
    %37 = arith.mulf %36, %33 : vector<16x130xf32>
    %38 = arith.select %35, %33, %37 : vector<16x130xi1>, vector<16x130xf32>
    %39 = arith.truncf %38 : vector<16x130xf32> to vector<16x130xbf16>
    %40 = vector.extract_strided_slice %39 {offsets = [0, 0], sizes = [16, 128], strides = [1, 1]} : vector<16x130xbf16> to vector<16x128xbf16>
    %41 = vector.extract_strided_slice %39 {offsets = [0, 1], sizes = [16, 128], strides = [1, 1]} : vector<16x130xbf16> to vector<16x128xbf16>
    %42 = vector.extract_strided_slice %39 {offsets = [0, 2], sizes = [16, 128], strides = [1, 1]} : vector<16x130xbf16> to vector<16x128xbf16>
    %43 = tpu.concatenate %40, %41, %42 in 0 : vector<16x128xbf16>, vector<16x128xbf16>, vector<16x128xbf16> -> vector<48x128xbf16>
    %c0_14 = arith.constant 0 : index
    %c0_15 = arith.constant 0 : index
    %44 = vector.load %arg6[%c0_14, %c0_15] : memref<16x48xbf16, #tpu.memory_space<vmem>>, vector<16x48xbf16>
    %cst_16 = arith.constant dense<0.000000e+00> : vector<16x128xf32>
    %45 = tpu.matmul %44, %43, %cst_16 {dimension_numbers = #tpu.dot_dimension_numbers<[1], [0], [0], [1], [0, 0, 1, 1], [], []>} : vector<16x48xbf16>, vector<48x128xbf16>, vector<16x128xf32> -> vector<16x128xf32>
    %c0_17 = arith.constant 0 : index
    %c0_18 = arith.constant 0 : index
    %46 = vector.load %arg7[%c0_17, %c0_18] : memref<16x1xf32, #tpu.memory_space<vmem>>, vector<16x1xf32>
    %47 = vector.broadcast %46 : vector<16x1xf32> to vector<16x128xf32>
    %48 = arith.addf %45, %47 : vector<16x128xf32>
    %49 = vector.extract_strided_slice %4 {offsets = [0, 4], sizes = [16, 128], strides = [1, 1]} : vector<16x256xf32> to vector<16x128xf32>
    %50 = arith.addf %48, %49 : vector<16x128xf32>
    %c0_19 = arith.constant 0 : index
    %c0_20 = arith.constant 0 : index
    %c0_21 = arith.constant 0 : index
    %51 = vector.load %arg8[%c0_19, %c0_20, %c0_21] : memref<1x16x128xf32, #tpu.memory_space<vmem>>, vector<1x16x128xf32>
    %52 = vector.shape_cast %51 : vector<1x16x128xf32> to vector<16x128xf32>
    %53 = vector.shape_cast %50 : vector<16x128xf32> to vector<1x16x128xf32>
    tpu.vector_store %arg8[%c0_19, %c0_20, %c0_21], %53 {strides = array<i32>} : memref<1x16x128xf32, #tpu.memory_space<vmem>>, vector<1x16x128xf32>,
    return
  }
  func.func @transform_0(%arg0: i32, %arg1: i32) -> (i32, i32, i32) {
    %c0_i32 = arith.constant 0 : i32
    %c0_i32_0 = arith.constant 0 : i32
    return %arg0, %c0_i32, %arg1 : i32, i32, i32
  }
  func.func @transform_1(%arg0: i32, %arg1: i32) -> (i32, i32, i32) {
    %c1_i32 = arith.constant 1 : i32
    %0 = arith.addi %arg1, %c1_i32 : i32
    %c1_i32_0 = arith.constant 1 : i32
    %1 = arith.muli %0, %c1_i32_0 : i32
    %c0_i32 = arith.constant 0 : i32
    %c0_i32_1 = arith.constant 0 : i32
    return %arg0, %c0_i32, %1 : i32, i32, i32
  }
  func.func @transform_2(%arg0: i32, %arg1: i32) -> (i32, i32) {
    %c0_i32 = arith.constant 0 : i32
    %c0_i32_0 = arith.constant 0 : i32
    %c0_i32_1 = arith.constant 0 : i32
    return %c0_i32, %c0_i32_0 : i32, i32
  }
  func.func @transform_3(%arg0: i32, %arg1: i32) -> (i32, i32) {
    %c0_i32 = arith.constant 0 : i32
    %c0_i32_0 = arith.constant 0 : i32
    %c0_i32_1 = arith.constant 0 : i32
    return %c0_i32, %c0_i32_0 : i32, i32
  }
  func.func @transform_4(%arg0: i32, %arg1: i32) -> (i32, i32) {
    %c0_i32 = arith.constant 0 : i32
    %c0_i32_0 = arith.constant 0 : i32
    %c0_i32_1 = arith.constant 0 : i32
    return %c0_i32, %c0_i32_0 : i32, i32
  }
  func.func @transform_5(%arg0: i32, %arg1: i32) -> (i32, i32) {
    %c0_i32 = arith.constant 0 : i32
    %c0_i32_0 = arith.constant 0 : i32
    %c0_i32_1 = arith.constant 0 : i32
    return %c0_i32, %c0_i32_0 : i32, i32
  }
  func.func @transform_6(%arg0: i32, %arg1: i32) -> (i32, i32, i32) {
    %c0_i32 = arith.constant 0 : i32
    %c0_i32_0 = arith.constant 0 : i32
    return %arg0, %c0_i32, %arg1 : i32, i32, i32
  }
}

module attributes {stable_mosaic.version = 11 : i64} {
  func.func @_res_unit_kernel(%arg0: i32, %arg1: i32, %arg2: memref<1x16x128xf32, #tpu.memory_space<vmem>>, %arg3: memref<1x16x128xf32, #tpu.memory_space<vmem>>, %arg4: memref<16x112xbf16, #tpu.memory_space<vmem>>, %arg5: memref<16x1xf32, #tpu.memory_space<vmem>>, %arg6: memref<16x112xbf16, #tpu.memory_space<vmem>>, %arg7: memref<16x1xf32, #tpu.memory_space<vmem>>, %arg8: memref<1x16x128xf32, #tpu.memory_space<vmem>>) attributes {dimension_semantics = [#tpu.dimension_semantics<parallel>, #tpu.dimension_semantics<parallel>], iteration_bounds = array<i64: 2, 1>, scalar_prefetch = 0 : i64, scratch_operands = 0 : i64, tpu.core_type = #tpu.core_type<tc>, window_params = [{transform_indices = @transform_0, window_bounds = array<i64: 1, 16, 128>}, {transform_indices = @transform_1, window_bounds = array<i64: 1, 16, 128>}, {pipeline_mode = #tpu.pipeline_mode<synchronous>, transform_indices = @transform_2, window_bounds = array<i64: 16, 112>}, {pipeline_mode = #tpu.pipeline_mode<synchronous>, transform_indices = @transform_3, window_bounds = array<i64: 16, 1>}, {pipeline_mode = #tpu.pipeline_mode<synchronous>, transform_indices = @transform_4, window_bounds = array<i64: 16, 112>}, {pipeline_mode = #tpu.pipeline_mode<synchronous>, transform_indices = @transform_5, window_bounds = array<i64: 16, 1>}, {transform_indices = @transform_6, window_bounds = array<i64: 1, 16, 128>}]} {
    %c0 = arith.constant 0 : index
    %c0_0 = arith.constant 0 : index
    %c0_1 = arith.constant 0 : index
    %0 = vector.load %arg2[%c0, %c0_0, %c0_1] : memref<1x16x128xf32, #tpu.memory_space<vmem>>, vector<1x16x128xf32>
    %1 = vector.shape_cast %0 : vector<1x16x128xf32> to vector<16x128xf32>
    %c0_2 = arith.constant 0 : index
    %c0_3 = arith.constant 0 : index
    %c0_4 = arith.constant 0 : index
    %2 = vector.load %arg3[%c0_2, %c0_3, %c0_4] : memref<1x16x128xf32, #tpu.memory_space<vmem>>, vector<1x16x128xf32>
    %3 = vector.shape_cast %2 : vector<1x16x128xf32> to vector<16x128xf32>
    %4 = tpu.concatenate %1, %3 in 1 : vector<16x128xf32>, vector<16x128xf32> -> vector<16x256xf32>
    %cst = arith.constant 0.000000e+00 : f32
    %5 = vector.broadcast %cst : f32 to vector<16x256xf32>
    %6 = arith.cmpf oge, %4, %5 : vector<16x256xf32>
    %cst_5 = arith.constant 1.000000e-01 : f32
    %7 = vector.broadcast %cst_5 : f32 to vector<16x256xf32>
    %8 = arith.mulf %7, %4 : vector<16x256xf32>
    %9 = arith.select %6, %4, %8 : vector<16x256xi1>, vector<16x256xf32>
    %10 = arith.truncf %9 : vector<16x256xf32> to vector<16x256xbf16>
    %11 = vector.extract_strided_slice %10 {offsets = [0, 0], sizes = [16, 134], strides = [1, 1]} : vector<16x256xbf16> to vector<16x134xbf16>
    %12 = vector.extract_strided_slice %10 {offsets = [0, 1], sizes = [16, 134], strides = [1, 1]} : vector<16x256xbf16> to vector<16x134xbf16>
    %13 = vector.extract_strided_slice %10 {offsets = [0, 2], sizes = [16, 134], strides = [1, 1]} : vector<16x256xbf16> to vector<16x134xbf16>
    %14 = vector.extract_strided_slice %10 {offsets = [0, 3], sizes = [16, 134], strides = [1, 1]} : vector<16x256xbf16> to vector<16x134xbf16>
    %15 = vector.extract_strided_slice %10 {offsets = [0, 4], sizes = [16, 134], strides = [1, 1]} : vector<16x256xbf16> to vector<16x134xbf16>
    %16 = vector.extract_strided_slice %10 {offsets = [0, 5], sizes = [16, 134], strides = [1, 1]} : vector<16x256xbf16> to vector<16x134xbf16>
    %17 = vector.extract_strided_slice %10 {offsets = [0, 6], sizes = [16, 134], strides = [1, 1]} : vector<16x256xbf16> to vector<16x134xbf16>
    %18 = tpu.concatenate %11, %12, %13, %14, %15, %16, %17 in 0 : vector<16x134xbf16>, vector<16x134xbf16>, vector<16x134xbf16>, vector<16x134xbf16>, vector<16x134xbf16>, vector<16x134xbf16>, vector<16x134xbf16> -> vector<112x134xbf16>
    %c0_6 = arith.constant 0 : index
    %c0_7 = arith.constant 0 : index
    %19 = vector.load %arg4[%c0_6, %c0_7] : memref<16x112xbf16, #tpu.memory_space<vmem>>, vector<16x112xbf16>
    %cst_8 = arith.constant dense<0.000000e+00> : vector<16x134xf32>
    %20 = tpu.matmul %19, %18, %cst_8 {dimension_numbers = #tpu.dot_dimension_numbers<[1], [0], [0], [1], [0, 0, 1, 1], [], []>} : vector<16x112xbf16>, vector<112x134xbf16>, vector<16x134xf32> -> vector<16x134xf32>
    %c0_9 = arith.constant 0 : index
    %c0_10 = arith.constant 0 : index
    %21 = vector.load %arg5[%c0_9, %c0_10] : memref<16x1xf32, #tpu.memory_space<vmem>>, vector<16x1xf32>
    %22 = vector.broadcast %21 : vector<16x1xf32> to vector<16x134xf32>
    %23 = arith.addf %20, %22 : vector<16x134xf32>
    %c128_i32 = arith.constant 128 : i32
    %24 = arith.muli %arg1, %c128_i32 : i32
    %c3_i32 = arith.constant 3 : i32
    %25 = arith.subi %24, %c3_i32 : i32
    %26 = tpu.iota {dimensions = array<i32: 1>} : vector<1x134xi32>
    %27 = vector.broadcast %25 : i32 to vector<1x134xi32>
    %28 = arith.addi %27, %26 : vector<1x134xi32>
    %c0_i32 = arith.constant 0 : i32
    %29 = vector.broadcast %c0_i32 : i32 to vector<1x134xi32>
    %30 = arith.cmpi sge, %28, %29 : vector<1x134xi32>
    %c32_i32 = arith.constant 32 : i32
    %31 = vector.broadcast %c32_i32 : i32 to vector<1x134xi32>
    %32 = arith.cmpi slt, %28, %31 : vector<1x134xi32>
    %33 = arith.andi %30, %32 : vector<1x134xi1>
    %cst_11 = arith.constant 0.000000e+00 : f32
    %34 = vector.shape_cast %33 : vector<1x134xi1> to vector<1x134xi1>
    %35 = vector.broadcast %34 : vector<1x134xi1> to vector<16x134xi1>
    %36 = vector.broadcast %cst_11 : f32 to vector<16x134xf32>
    %37 = arith.select %35, %23, %36 : vector<16x134xi1>, vector<16x134xf32>
    %cst_12 = arith.constant 0.000000e+00 : f32
    %38 = vector.broadcast %cst_12 : f32 to vector<16x134xf32>
    %39 = arith.cmpf oge, %37, %38 : vector<16x134xf32>
    %cst_13 = arith.constant 1.000000e-01 : f32
    %40 = vector.broadcast %cst_13 : f32 to vector<16x134xf32>
    %41 = arith.mulf %40, %37 : vector<16x134xf32>
    %42 = arith.select %39, %37, %41 : vector<16x134xi1>, vector<16x134xf32>
    %43 = arith.truncf %42 : vector<16x134xf32> to vector<16x134xbf16>
    %44 = vector.extract_strided_slice %43 {offsets = [0, 0], sizes = [16, 128], strides = [1, 1]} : vector<16x134xbf16> to vector<16x128xbf16>
    %45 = vector.extract_strided_slice %43 {offsets = [0, 1], sizes = [16, 128], strides = [1, 1]} : vector<16x134xbf16> to vector<16x128xbf16>
    %46 = vector.extract_strided_slice %43 {offsets = [0, 2], sizes = [16, 128], strides = [1, 1]} : vector<16x134xbf16> to vector<16x128xbf16>
    %47 = vector.extract_strided_slice %43 {offsets = [0, 3], sizes = [16, 128], strides = [1, 1]} : vector<16x134xbf16> to vector<16x128xbf16>
    %48 = vector.extract_strided_slice %43 {offsets = [0, 4], sizes = [16, 128], strides = [1, 1]} : vector<16x134xbf16> to vector<16x128xbf16>
    %49 = vector.extract_strided_slice %43 {offsets = [0, 5], sizes = [16, 128], strides = [1, 1]} : vector<16x134xbf16> to vector<16x128xbf16>
    %50 = vector.extract_strided_slice %43 {offsets = [0, 6], sizes = [16, 128], strides = [1, 1]} : vector<16x134xbf16> to vector<16x128xbf16>
    %51 = tpu.concatenate %44, %45, %46, %47, %48, %49, %50 in 0 : vector<16x128xbf16>, vector<16x128xbf16>, vector<16x128xbf16>, vector<16x128xbf16>, vector<16x128xbf16>, vector<16x128xbf16>, vector<16x128xbf16> -> vector<112x128xbf16>
    %c0_14 = arith.constant 0 : index
    %c0_15 = arith.constant 0 : index
    %52 = vector.load %arg6[%c0_14, %c0_15] : memref<16x112xbf16, #tpu.memory_space<vmem>>, vector<16x112xbf16>
    %cst_16 = arith.constant dense<0.000000e+00> : vector<16x128xf32>
    %53 = tpu.matmul %52, %51, %cst_16 {dimension_numbers = #tpu.dot_dimension_numbers<[1], [0], [0], [1], [0, 0, 1, 1], [], []>} : vector<16x112xbf16>, vector<112x128xbf16>, vector<16x128xf32> -> vector<16x128xf32>
    %c0_17 = arith.constant 0 : index
    %c0_18 = arith.constant 0 : index
    %54 = vector.load %arg7[%c0_17, %c0_18] : memref<16x1xf32, #tpu.memory_space<vmem>>, vector<16x1xf32>
    %55 = vector.broadcast %54 : vector<16x1xf32> to vector<16x128xf32>
    %56 = arith.addf %53, %55 : vector<16x128xf32>
    %57 = vector.extract_strided_slice %4 {offsets = [0, 6], sizes = [16, 128], strides = [1, 1]} : vector<16x256xf32> to vector<16x128xf32>
    %58 = arith.addf %56, %57 : vector<16x128xf32>
    %c0_19 = arith.constant 0 : index
    %c0_20 = arith.constant 0 : index
    %c0_21 = arith.constant 0 : index
    %59 = vector.load %arg8[%c0_19, %c0_20, %c0_21] : memref<1x16x128xf32, #tpu.memory_space<vmem>>, vector<1x16x128xf32>
    %60 = vector.shape_cast %59 : vector<1x16x128xf32> to vector<16x128xf32>
    %61 = vector.shape_cast %58 : vector<16x128xf32> to vector<1x16x128xf32>
    tpu.vector_store %arg8[%c0_19, %c0_20, %c0_21], %61 {strides = array<i32>} : memref<1x16x128xf32, #tpu.memory_space<vmem>>, vector<1x16x128xf32>,
    return
  }
  func.func @transform_0(%arg0: i32, %arg1: i32) -> (i32, i32, i32) {
    %c0_i32 = arith.constant 0 : i32
    %c0_i32_0 = arith.constant 0 : i32
    return %arg0, %c0_i32, %arg1 : i32, i32, i32
  }
  func.func @transform_1(%arg0: i32, %arg1: i32) -> (i32, i32, i32) {
    %c1_i32 = arith.constant 1 : i32
    %0 = arith.addi %arg1, %c1_i32 : i32
    %c1_i32_0 = arith.constant 1 : i32
    %1 = arith.muli %0, %c1_i32_0 : i32
    %c0_i32 = arith.constant 0 : i32
    %c0_i32_1 = arith.constant 0 : i32
    return %arg0, %c0_i32, %1 : i32, i32, i32
  }
  func.func @transform_2(%arg0: i32, %arg1: i32) -> (i32, i32) {
    %c0_i32 = arith.constant 0 : i32
    %c0_i32_0 = arith.constant 0 : i32
    %c0_i32_1 = arith.constant 0 : i32
    return %c0_i32, %c0_i32_0 : i32, i32
  }
  func.func @transform_3(%arg0: i32, %arg1: i32) -> (i32, i32) {
    %c0_i32 = arith.constant 0 : i32
    %c0_i32_0 = arith.constant 0 : i32
    %c0_i32_1 = arith.constant 0 : i32
    return %c0_i32, %c0_i32_0 : i32, i32
  }
  func.func @transform_4(%arg0: i32, %arg1: i32) -> (i32, i32) {
    %c0_i32 = arith.constant 0 : i32
    %c0_i32_0 = arith.constant 0 : i32
    %c0_i32_1 = arith.constant 0 : i32
    return %c0_i32, %c0_i32_0 : i32, i32
  }
  func.func @transform_5(%arg0: i32, %arg1: i32) -> (i32, i32) {
    %c0_i32 = arith.constant 0 : i32
    %c0_i32_0 = arith.constant 0 : i32
    %c0_i32_1 = arith.constant 0 : i32
    return %c0_i32, %c0_i32_0 : i32, i32
  }
  func.func @transform_6(%arg0: i32, %arg1: i32) -> (i32, i32, i32) {
    %c0_i32 = arith.constant 0 : i32
    %c0_i32_0 = arith.constant 0 : i32
    return %arg0, %c0_i32, %arg1 : i32, i32, i32
  }
}

module attributes {stable_mosaic.version = 11 : i64} {
  func.func @_res_unit_kernel(%arg0: i32, %arg1: i32, %arg2: memref<1x16x128xf32, #tpu.memory_space<vmem>>, %arg3: memref<1x16x128xf32, #tpu.memory_space<vmem>>, %arg4: memref<16x112xbf16, #tpu.memory_space<vmem>>, %arg5: memref<16x1xf32, #tpu.memory_space<vmem>>, %arg6: memref<16x112xbf16, #tpu.memory_space<vmem>>, %arg7: memref<16x1xf32, #tpu.memory_space<vmem>>, %arg8: memref<1x16x128xf32, #tpu.memory_space<vmem>>, %arg9: memref<1x16x128xf32, #tpu.memory_space<vmem>>) attributes {dimension_semantics = [#tpu.dimension_semantics<parallel>, #tpu.dimension_semantics<parallel>], iteration_bounds = array<i64: 2, 1>, scalar_prefetch = 0 : i64, scratch_operands = 0 : i64, tpu.core_type = #tpu.core_type<tc>, window_params = [{transform_indices = @transform_0, window_bounds = array<i64: 1, 16, 128>}, {transform_indices = @transform_1, window_bounds = array<i64: 1, 16, 128>}, {pipeline_mode = #tpu.pipeline_mode<synchronous>, transform_indices = @transform_2, window_bounds = array<i64: 16, 112>}, {pipeline_mode = #tpu.pipeline_mode<synchronous>, transform_indices = @transform_3, window_bounds = array<i64: 16, 1>}, {pipeline_mode = #tpu.pipeline_mode<synchronous>, transform_indices = @transform_4, window_bounds = array<i64: 16, 112>}, {pipeline_mode = #tpu.pipeline_mode<synchronous>, transform_indices = @transform_5, window_bounds = array<i64: 16, 1>}, {transform_indices = @transform_6, window_bounds = array<i64: 1, 16, 128>}, {transform_indices = @transform_7, window_bounds = array<i64: 1, 16, 128>}]} {
    %c0 = arith.constant 0 : index
    %c0_0 = arith.constant 0 : index
    %c0_1 = arith.constant 0 : index
    %0 = vector.load %arg2[%c0, %c0_0, %c0_1] : memref<1x16x128xf32, #tpu.memory_space<vmem>>, vector<1x16x128xf32>
    %1 = vector.shape_cast %0 : vector<1x16x128xf32> to vector<16x128xf32>
    %c0_2 = arith.constant 0 : index
    %c0_3 = arith.constant 0 : index
    %c0_4 = arith.constant 0 : index
    %2 = vector.load %arg3[%c0_2, %c0_3, %c0_4] : memref<1x16x128xf32, #tpu.memory_space<vmem>>, vector<1x16x128xf32>
    %3 = vector.shape_cast %2 : vector<1x16x128xf32> to vector<16x128xf32>
    %4 = tpu.concatenate %1, %3 in 1 : vector<16x128xf32>, vector<16x128xf32> -> vector<16x256xf32>
    %cst = arith.constant 0.000000e+00 : f32
    %5 = vector.broadcast %cst : f32 to vector<16x256xf32>
    %6 = arith.cmpf oge, %4, %5 : vector<16x256xf32>
    %cst_5 = arith.constant 1.000000e-01 : f32
    %7 = vector.broadcast %cst_5 : f32 to vector<16x256xf32>
    %8 = arith.mulf %7, %4 : vector<16x256xf32>
    %9 = arith.select %6, %4, %8 : vector<16x256xi1>, vector<16x256xf32>
    %10 = arith.truncf %9 : vector<16x256xf32> to vector<16x256xbf16>
    %11 = vector.extract_strided_slice %10 {offsets = [0, 0], sizes = [16, 134], strides = [1, 1]} : vector<16x256xbf16> to vector<16x134xbf16>
    %12 = vector.extract_strided_slice %10 {offsets = [0, 3], sizes = [16, 134], strides = [1, 1]} : vector<16x256xbf16> to vector<16x134xbf16>
    %13 = vector.extract_strided_slice %10 {offsets = [0, 6], sizes = [16, 134], strides = [1, 1]} : vector<16x256xbf16> to vector<16x134xbf16>
    %14 = vector.extract_strided_slice %10 {offsets = [0, 9], sizes = [16, 134], strides = [1, 1]} : vector<16x256xbf16> to vector<16x134xbf16>
    %15 = vector.extract_strided_slice %10 {offsets = [0, 12], sizes = [16, 134], strides = [1, 1]} : vector<16x256xbf16> to vector<16x134xbf16>
    %16 = vector.extract_strided_slice %10 {offsets = [0, 15], sizes = [16, 134], strides = [1, 1]} : vector<16x256xbf16> to vector<16x134xbf16>
    %17 = vector.extract_strided_slice %10 {offsets = [0, 18], sizes = [16, 134], strides = [1, 1]} : vector<16x256xbf16> to vector<16x134xbf16>
    %18 = tpu.concatenate %11, %12, %13, %14, %15, %16, %17 in 0 : vector<16x134xbf16>, vector<16x134xbf16>, vector<16x134xbf16>, vector<16x134xbf16>, vector<16x134xbf16>, vector<16x134xbf16>, vector<16x134xbf16> -> vector<112x134xbf16>
    %c0_6 = arith.constant 0 : index
    %c0_7 = arith.constant 0 : index
    %19 = vector.load %arg4[%c0_6, %c0_7] : memref<16x112xbf16, #tpu.memory_space<vmem>>, vector<16x112xbf16>
    %cst_8 = arith.constant dense<0.000000e+00> : vector<16x134xf32>
    %20 = tpu.matmul %19, %18, %cst_8 {dimension_numbers = #tpu.dot_dimension_numbers<[1], [0], [0], [1], [0, 0, 1, 1], [], []>} : vector<16x112xbf16>, vector<112x134xbf16>, vector<16x134xf32> -> vector<16x134xf32>
    %c0_9 = arith.constant 0 : index
    %c0_10 = arith.constant 0 : index
    %21 = vector.load %arg5[%c0_9, %c0_10] : memref<16x1xf32, #tpu.memory_space<vmem>>, vector<16x1xf32>
    %22 = vector.broadcast %21 : vector<16x1xf32> to vector<16x134xf32>
    %23 = arith.addf %20, %22 : vector<16x134xf32>
    %c128_i32 = arith.constant 128 : i32
    %24 = arith.muli %arg1, %c128_i32 : i32
    %c3_i32 = arith.constant 3 : i32
    %25 = arith.subi %24, %c3_i32 : i32
    %26 = tpu.iota {dimensions = array<i32: 1>} : vector<1x134xi32>
    %27 = vector.broadcast %25 : i32 to vector<1x134xi32>
    %28 = arith.addi %27, %26 : vector<1x134xi32>
    %c0_i32 = arith.constant 0 : i32
    %29 = vector.broadcast %c0_i32 : i32 to vector<1x134xi32>
    %30 = arith.cmpi sge, %28, %29 : vector<1x134xi32>
    %c32_i32 = arith.constant 32 : i32
    %31 = vector.broadcast %c32_i32 : i32 to vector<1x134xi32>
    %32 = arith.cmpi slt, %28, %31 : vector<1x134xi32>
    %33 = arith.andi %30, %32 : vector<1x134xi1>
    %cst_11 = arith.constant 0.000000e+00 : f32
    %34 = vector.shape_cast %33 : vector<1x134xi1> to vector<1x134xi1>
    %35 = vector.broadcast %34 : vector<1x134xi1> to vector<16x134xi1>
    %36 = vector.broadcast %cst_11 : f32 to vector<16x134xf32>
    %37 = arith.select %35, %23, %36 : vector<16x134xi1>, vector<16x134xf32>
    %cst_12 = arith.constant 0.000000e+00 : f32
    %38 = vector.broadcast %cst_12 : f32 to vector<16x134xf32>
    %39 = arith.cmpf oge, %37, %38 : vector<16x134xf32>
    %cst_13 = arith.constant 1.000000e-01 : f32
    %40 = vector.broadcast %cst_13 : f32 to vector<16x134xf32>
    %41 = arith.mulf %40, %37 : vector<16x134xf32>
    %42 = arith.select %39, %37, %41 : vector<16x134xi1>, vector<16x134xf32>
    %43 = arith.truncf %42 : vector<16x134xf32> to vector<16x134xbf16>
    %44 = vector.extract_strided_slice %43 {offsets = [0, 0], sizes = [16, 128], strides = [1, 1]} : vector<16x134xbf16> to vector<16x128xbf16>
    %45 = vector.extract_strided_slice %43 {offsets = [0, 1], sizes = [16, 128], strides = [1, 1]} : vector<16x134xbf16> to vector<16x128xbf16>
    %46 = vector.extract_strided_slice %43 {offsets = [0, 2], sizes = [16, 128], strides = [1, 1]} : vector<16x134xbf16> to vector<16x128xbf16>
    %47 = vector.extract_strided_slice %43 {offsets = [0, 3], sizes = [16, 128], strides = [1, 1]} : vector<16x134xbf16> to vector<16x128xbf16>
    %48 = vector.extract_strided_slice %43 {offsets = [0, 4], sizes = [16, 128], strides = [1, 1]} : vector<16x134xbf16> to vector<16x128xbf16>
    %49 = vector.extract_strided_slice %43 {offsets = [0, 5], sizes = [16, 128], strides = [1, 1]} : vector<16x134xbf16> to vector<16x128xbf16>
    %50 = vector.extract_strided_slice %43 {offsets = [0, 6], sizes = [16, 128], strides = [1, 1]} : vector<16x134xbf16> to vector<16x128xbf16>
    %51 = tpu.concatenate %44, %45, %46, %47, %48, %49, %50 in 0 : vector<16x128xbf16>, vector<16x128xbf16>, vector<16x128xbf16>, vector<16x128xbf16>, vector<16x128xbf16>, vector<16x128xbf16>, vector<16x128xbf16> -> vector<112x128xbf16>
    %c0_14 = arith.constant 0 : index
    %c0_15 = arith.constant 0 : index
    %52 = vector.load %arg6[%c0_14, %c0_15] : memref<16x112xbf16, #tpu.memory_space<vmem>>, vector<16x112xbf16>
    %cst_16 = arith.constant dense<0.000000e+00> : vector<16x128xf32>
    %53 = tpu.matmul %52, %51, %cst_16 {dimension_numbers = #tpu.dot_dimension_numbers<[1], [0], [0], [1], [0, 0, 1, 1], [], []>} : vector<16x112xbf16>, vector<112x128xbf16>, vector<16x128xf32> -> vector<16x128xf32>
    %c0_17 = arith.constant 0 : index
    %c0_18 = arith.constant 0 : index
    %54 = vector.load %arg7[%c0_17, %c0_18] : memref<16x1xf32, #tpu.memory_space<vmem>>, vector<16x1xf32>
    %55 = vector.broadcast %54 : vector<16x1xf32> to vector<16x128xf32>
    %56 = arith.addf %53, %55 : vector<16x128xf32>
    %57 = vector.extract_strided_slice %4 {offsets = [0, 12], sizes = [16, 128], strides = [1, 1]} : vector<16x256xf32> to vector<16x128xf32>
    %58 = arith.addf %56, %57 : vector<16x128xf32>
    %c0_19 = arith.constant 0 : index
    %c0_20 = arith.constant 0 : index
    %c0_21 = arith.constant 0 : index
    %59 = vector.load %arg8[%c0_19, %c0_20, %c0_21] : memref<1x16x128xf32, #tpu.memory_space<vmem>>, vector<1x16x128xf32>
    %60 = vector.shape_cast %59 : vector<1x16x128xf32> to vector<16x128xf32>
    %61 = arith.addf %58, %60 : vector<16x128xf32>
    %cst_22 = arith.constant 5.000000e-01 : f32
    %62 = vector.broadcast %cst_22 : f32 to vector<16x128xf32>
    %63 = arith.mulf %61, %62 : vector<16x128xf32>
    %c0_23 = arith.constant 0 : index
    %c0_24 = arith.constant 0 : index
    %c0_25 = arith.constant 0 : index
    %64 = vector.load %arg9[%c0_23, %c0_24, %c0_25] : memref<1x16x128xf32, #tpu.memory_space<vmem>>, vector<1x16x128xf32>
    %65 = vector.shape_cast %64 : vector<1x16x128xf32> to vector<16x128xf32>
    %66 = vector.shape_cast %63 : vector<16x128xf32> to vector<1x16x128xf32>
    tpu.vector_store %arg9[%c0_23, %c0_24, %c0_25], %66 {strides = array<i32>} : memref<1x16x128xf32, #tpu.memory_space<vmem>>, vector<1x16x128xf32>,
    return
  }
  func.func @transform_0(%arg0: i32, %arg1: i32) -> (i32, i32, i32) {
    %c0_i32 = arith.constant 0 : i32
    %c0_i32_0 = arith.constant 0 : i32
    return %arg0, %c0_i32, %arg1 : i32, i32, i32
  }
  func.func @transform_1(%arg0: i32, %arg1: i32) -> (i32, i32, i32) {
    %c1_i32 = arith.constant 1 : i32
    %0 = arith.addi %arg1, %c1_i32 : i32
    %c1_i32_0 = arith.constant 1 : i32
    %1 = arith.muli %0, %c1_i32_0 : i32
    %c0_i32 = arith.constant 0 : i32
    %c0_i32_1 = arith.constant 0 : i32
    return %arg0, %c0_i32, %1 : i32, i32, i32
  }
  func.func @transform_2(%arg0: i32, %arg1: i32) -> (i32, i32) {
    %c0_i32 = arith.constant 0 : i32
    %c0_i32_0 = arith.constant 0 : i32
    %c0_i32_1 = arith.constant 0 : i32
    return %c0_i32, %c0_i32_0 : i32, i32
  }
  func.func @transform_3(%arg0: i32, %arg1: i32) -> (i32, i32) {
    %c0_i32 = arith.constant 0 : i32
    %c0_i32_0 = arith.constant 0 : i32
    %c0_i32_1 = arith.constant 0 : i32
    return %c0_i32, %c0_i32_0 : i32, i32
  }
  func.func @transform_4(%arg0: i32, %arg1: i32) -> (i32, i32) {
    %c0_i32 = arith.constant 0 : i32
    %c0_i32_0 = arith.constant 0 : i32
    %c0_i32_1 = arith.constant 0 : i32
    return %c0_i32, %c0_i32_0 : i32, i32
  }
  func.func @transform_5(%arg0: i32, %arg1: i32) -> (i32, i32) {
    %c0_i32 = arith.constant 0 : i32
    %c0_i32_0 = arith.constant 0 : i32
    %c0_i32_1 = arith.constant 0 : i32
    return %c0_i32, %c0_i32_0 : i32, i32
  }
  func.func @transform_6(%arg0: i32, %arg1: i32) -> (i32, i32, i32) {
    %c0_i32 = arith.constant 0 : i32
    %c0_i32_0 = arith.constant 0 : i32
    return %arg0, %c0_i32, %arg1 : i32, i32, i32
  }
  func.func @transform_7(%arg0: i32, %arg1: i32) -> (i32, i32, i32) {
    %c0_i32 = arith.constant 0 : i32
    %c0_i32_0 = arith.constant 0 : i32
    return %arg0, %c0_i32, %arg1 : i32, i32, i32
  }
}

</mosaic_0001>

<bundles_post_ra>
// kernel: forward.5
= control target key start
LH: loop header
LB: loop body
LE: loop exit
PB: predicated region body
PF: predicated region fallthrough
CT: control target
= control target key end

     0   :  { %s782_s15 = smov 0   ;;  %s784_s16 = smov 0   ;;  %s887_s0 = inlined_call_operand.vmem [shape: f32[2,32,256], index: 0, kind: input, shape index: {}, may-alias: {0,1}]   ;;  %s888_s1 = inlined_call_operand.vmem [shape: f32[2,32,256], index: 1, kind: input, shape index: {}, may-alias: {0,1}]   ;;  %s889_s2 = inlined_call_operand.vmem [shape: bf16[32,96], index: 2, kind: input, shape index: {}]   ;;  %s890_s3 = inlined_call_operand.vmem [shape: f32[32,1], index: 3, kind: input, shape index: {}]   ;;  %s891_s4 = inlined_call_operand.vmem [shape: f32[2,32,128], index: 4, kind: output, shape index: {}]  }
   0x1   :  { %s786_s17 = smov 0   ;;  %s788_s18 = smov 0  }
   0x2   :  { %s790_s19 = smov 0  }
   0x3 LB: > { %s26_s20 = sadd.s32 1, %s748_s18  ;;  %p42_p1 = scmp.ne.s32.totalorder %s740_s16, %s736_s15  ;;  %s752_s19 = sphi %s790_s19, %s14_s19   ;;  %s748_s18 = sphi %s788_s18, %s896_s18   ;;  %s744_s17 = sphi %s786_s17, %s895_s17   ;;  %s740_s16 = sphi %s784_s16, %s894_s16   ;;  %s736_s15 = sphi %s782_s15, %s893_s15  }
   0x4   : > { %p28_p0 = scmp.ge.s32.totalorder %s26_s20, 2  ;;  %p43_p2 = scmp.eq.s32.totalorder %s752_s19, 0 }
   0x5   : > { %s35_s23 = sadd.s32 1, %s740_s16  ;;  %p618_p5 = scmp.ge.s32.totalorder %s752_s19, 2 }
   0x6   : > { %s898_s20 = smov (%p28_p0, %s26_s20), 0  ;;  %p813_p3 = por %p43_p2, %p42_p1 }
   0x7   : > { %s30_s22 = ssub.s32 %s748_s18, %s898_s20  ;;  %174 = sbr.rel (%p618_p5) target bundleno = 24 (0x18), region = 24 }
   0x8   : > { %p33_p4 = scmp.eq.s32.totalorder %s30_s22, 0 }
   0xa   : > { %s821_s24 = scalar_select %p33_p4, %s740_s16, %s35_s23  }
   0xc   : > { %177 = sbr.rel (!%p813_p3) target bundleno = 18 (0x12), region = 28  ;;  %s179_s25 = sand.u32 (%p813_p3), 1, %s740_s16  }
   0xd   : > { %s640_s26 = sshll.u32 (%p813_p3), %s748_s18, 6  ;;  %s619_s27 = sshll.u32 (%p813_p3), %s179_s25, 5 }
   0xe   : > { %s185_s30 = scalar_lea.vmem (%p813_p3), %s887_s0, %s640_s26  ;;  %s181_s5 = scalar_lea.vmem (%p813_p3), [#allocation2], %s619_s27 }
   0xf   : > { %v220_v0 = vld [vmem:[%s185_s30] sm:$0xff] (%p813_p3)  ;;  %v222_v1 = vld [vmem:[%s185_s30 + $0x10] sm:$0xff] (%p813_p3) }
  0x10   : > { %v224_v2 = vld [vmem:[%s185_s30 + $0x20] sm:$0xff] (%p813_p3)  ;;  %221 = vst [vmem:[%s181_s5] sm:$0xff] (%p813_p3), %v220_v0  ;;  %223 = vst [vmem:[%s181_s5 + $0x8] sm:$0xff] (%p813_p3), %v222_v1  ;;  %v226_v3 = vld [vmem:[%s185_s30 + $0x30] sm:$0xff] (%p813_p3) }
  0x11   : > { %225 = vst [vmem:[%s181_s5 + $0x10] sm:$0xff] %v224_v2  ;;  %227 = vst [vmem:[%s181_s5 + $0x18] sm:$0xff] %v226_v3 }
  0x12 PF: > { %233 = sbr.rel (!%p813_p3) target bundleno = 24 (0x18), region = 66  ;;  %s235_s6 = sand.u32 (%p813_p3), 1, %s740_s16  }
  0x13   : > { %s641_s7 = sshll.u32 (%p813_p3), %s748_s18, 6  ;;  %s622_s8 = sshll.u32 (%p813_p3), %s235_s6, 5 }
  0x14   : > { %s547_s11 = scalar_lea.vmem (%p813_p3), %s888_s1, %s641_s7  ;;  %s237_s12 = scalar_lea.vmem (%p813_p3), [#allocation3], %s622_s8 }
  0x15   : > { %v625_v4 = vld [vmem:[%s547_s11 + $0x8] sm:$0xff] (%p813_p3)  ;;  %v626_v5 = vld [vmem:[%s547_s11 + $0x18] sm:$0xff] (%p813_p3) }
  0x16   : > { %v627_v6 = vld [vmem:[%s547_s11 + $0x28] sm:$0xff] (%p813_p3)  ;;  %278 = vst [vmem:[%s237_s12] sm:$0xff] (%p813_p3), %v625_v4  ;;  %280 = vst [vmem:[%s237_s12 + $0x8] sm:$0xff] (%p813_p3), %v626_v5  ;;  %v628_v7 = vld [vmem:[%s547_s11 + $0x38] sm:$0xff] (%p813_p3) }
  0x17   : > { %282 = vst [vmem:[%s237_s12 + $0x10] sm:$0xff] %v627_v6  ;;  %284 = vst [vmem:[%s237_s12 + $0x18] sm:$0xff] %v628_v7 }
  0x18 PF: > { %p629_p6 = scmp.ge.s32.totalorder %s752_s19, 1  ;;  %p289_p7 = scmp.lt.s32.totalorder %s752_s19, 3 }
  0x1a   : > { %p290_p8 = pnand %p629_p6, %p289_p7 }
  0x1b   : > { %s296_s13 = sand.u32 (!%p290_p8), 1, %s736_s15   ;;  %s754_s15 = smov (!%p290_p8), 126  }
  0x1c   : > { %293 = sbr.rel (%p290_p8) target bundleno = 385 (0x181), region = 104  ;;  %s630_s14 = sshll.u32 (!%p290_p8), %s296_s13, 5 }
  0x1d   : > { %s298_s21 = scalar_lea.vmem (!%p290_p8), [#allocation2], %s630_s14  ;;  %s305_s22 = scalar_lea.vmem (!%p290_p8), [#allocation3], %s630_s14 }
  0x1e   : > { %s755_s23 = smov (!%p290_p8), 127   ;;  %p336_p9 = scmp.lt.s32.totalorder (!%p290_p8), %s744_s17, 1 }
  0x21   : > { %v347_v8 = vld [vmem:[%s298_s21 + $0x10] sm:$0xff]  ;;  %v348_v9 = vld [vmem:[%s298_s21 + $0x18] sm:$0xff]  ;;  %v345_v10 = vld [vmem:[%s298_s21] sm:$0xff]  ;;  %vm449_vm8 = vcmask 785408   ;;  %v756_v39 = vmov 0   ;;  %vm406_vm9 = vcmask 1031168  }
  0x22   : > { %vm357_vm0 = vcmp.ge.f32.partialorder %v347_v8, 0.0  ;;  %vm359_vm1 = vcmp.ge.f32.partialorder %v348_v9, 0.0  ;;  %v365_v11 = vmul.f32 0.1, %v347_v8  ;;  %v367_v12 = vmul.f32 0.1, %v348_v9  ;;  %711 = vset.pattern.permute.xlu1 %v756_v39  ;;  %710 = vset.pattern.permute.xlu0 %v756_v39 }
  0x23   : > { %v346_v13 = vld [vmem:[%s298_s21 + $0x8] sm:$0xff]  ;;  %vm353_vm2 = vcmp.ge.f32.partialorder %v345_v10, 0.0  ;;  %v361_v14 = vmul.f32 0.1, %v345_v10  ;;  %v351_v15 = vld [vmem:[%s305_s22 + $0x10] sm:$0xff]  ;;  %v352_v16 = vld [vmem:[%s305_s22 + $0x18] sm:$0xff] }
  0x24   : > { %v373_v17 = vsel %vm357_vm0, %v347_v8, %v365_v11  ;;  %v375_v18 = vsel %vm359_vm1, %v348_v9, %v367_v12  ;;  %vm355_vm3 = vcmp.ge.f32.partialorder %v346_v13, 0.0  ;;  %v363_v19 = vmul.f32 0.1, %v346_v13  ;;  %v349_v20 = vld [vmem:[%s305_s22] sm:$0xff]  ;;  %v350_v21 = vld [vmem:[%s305_s22 + $0x8] sm:$0xff]  ;;  %v417_v40 = vld [vmem:[%s890_s3 + $0x10] sm:$0xff] }
  0x25   : > { %v841_v22 = vpack.c.bf16 %v375_v18, %v373_v17  ;;  %v369_v23 = vsel %vm353_vm2, %v345_v10, %v361_v14  ;;  %vm358_vm4 = vcmp.ge.f32.partialorder %v351_v15, 0.0  ;;  %vm360_vm5 = vcmp.ge.f32.partialorder %v352_v16, 0.0  ;;  %v712_v36 = vld [vmem:[%s889_s2] sm:$0xff]   ;;  %v416_v37 = vld [vmem:[%s890_s3 + $0x8] sm:$0xff]  ;;  %v418_v41 = vld [vmem:[%s890_s3 + $0x18] sm:$0xff]  ;;  %s900_s17 = smov (!%p336_p9, %s744_s17), 1 }
  0x26   : > { %v371_v24 = vsel %vm355_vm3, %v346_v13, %v363_v19  ;;  %v366_v25 = vmul.f32 0.1, %v351_v15  ;;  %v368_v26 = vmul.f32 0.1, %v352_v16  ;;  %vm354_vm6 = vcmp.ge.f32.partialorder %v349_v20, 0.0  ;;  %663 = vmatprep.mubr.msk.bf16.mxu0 %vm449_vm8, %v712_v36  ;;  %v415_v38 = vld [vmem:[%s890_s3] sm:$0xff] }
  0x27   : > { %402 = vrot.lane.b32.xlu0 %v841_v22, %s754_s15  ;;  %v377_v27 = vpack.c.bf16 %v371_v24, %v369_v23  ;;  %vm356_vm7 = vcmp.ge.f32.partialorder %v350_v21, 0.0  ;;  %v362_v28 = vmul.f32 0.1, %v349_v20  ;;  %v364_v29 = vmul.f32 0.1, %v350_v21  ;;  %v713_v54 = vld [vmem:[%s889_s2 + $0x8] sm:$0xff]  }
  0x28   : > { %v374_v30 = vsel %vm358_vm4, %v351_v15, %v366_v25  ;;  %v376_v31 = vsel %vm360_vm5, %v352_v16, %v368_v26  ;;  %vm393_vm10 = vcmask 1039360   ;;  %s642_s11 = sshll.u32 %s900_s17, 5 }
  0x29   : > { %398 = vrot.lane.b32.xlu1 %v377_v27, %s754_s15  ;;  %v380_v32 = vpack.c.bf16 %v376_v31, %v374_v30  ;;  %v370_v33 = vsel %vm354_vm6, %v349_v20, %v362_v28  ;;  %v372_v34 = vsel %vm356_vm7, %v350_v21, %v364_v29  ;;  %s343_s14 = scalar_lea.vmem %s891_s4, %s642_s11 }
  0x2a   : > { %v378_v35 = vpack.c.bf16 %v372_v34, %v370_v33 }
  0x2b   : > { %404 = vrot.lane.b32.xlu0 %v380_v32, %s754_s15 }
  0x2d   : > { %400 = vrot.lane.b32.xlu1 %v378_v35, %s754_s15 }
  0x2f   : > { %389 = vrot.lane.b32.xlu0 %v841_v22, %s755_s23 }
  0x31   : > { %391 = vrot.lane.b32.xlu1 %v380_v32, %s755_s23 }
  0x33   : > { %385 = vrot.lane.b32.xlu0 %v377_v27, %s755_s23 }
  0x35   : > { %387 = vrot.lane.b32.xlu1 %v378_v35, %s755_s23 }
  0x37   : > { %421 = vperm.xlu0 %710, %v415_v38  }
  0x39   : > { %426 = vperm.xlu1 %711, %v416_v37  }
  0x3b   : > { %436 = vperm.xlu0 %710, %v418_v41  }
  0x3d   : > { %431 = vperm.xlu1 %711, %v417_v40  }
  0x99   : > { %v403_v42 = vpop.permute.xlu0 %402 }
  0x9b   : > { %v399_v43 = vpop.permute.xlu1 %398 }
  0x9d   : > { %v405_v44 = vpop.permute.xlu0 %404 }
  0x9e   : > { %v408_v45 = vsel %vm406_vm9, %v403_v42, %v405_v44 }
  0x9f   : > { %v401_v46 = vpop.permute.xlu1 %400  ;;  %651 = vmatprep.subr.bf16.mxu0 %v408_v45 }
  0xa0   : > { %652 = vmatpush3.bf16.msra.mxu0 %v408_v45  ;;  %v407_v47 = vsel %vm406_vm9, %v399_v43, %v401_v46 }
  0xa1   : > { %653 = vmatprep.subr.bf16.mxu0 %v407_v47  ;;  %v390_v48 = vpop.permute.xlu0 %389 }
  0xa3   : > { %v392_v49 = vpop.permute.xlu1 %391 }
  0xa4   : > { %654 = vmatpush3.bf16.msra.mxu0 %v407_v47  ;;  %v395_v50 = vsel %vm393_vm10, %v390_v48, %v392_v49 }
  0xa5   : > { %655 = vmatprep.subr.bf16.mxu0 %v395_v50  ;;  %v386_v51 = vpop.permute.xlu0 %385 }
  0xa7   : > { %v388_v52 = vpop.permute.xlu1 %387 }
  0xa8   : > { %656 = vmatpush3.bf16.msra.mxu0 %v395_v50  ;;  %v394_v53 = vsel %vm393_vm10, %v386_v51, %v388_v52 }
  0xa9   : > { %657 = vmatprep.subr.bf16.mxu0 %v394_v53 }
  0xac   : > { %658 = vmatpush3.bf16.msra.mxu0 %v394_v53 }
  0xad   : > { %659 = vmatprep.subr.bf16.mxu0 %v841_v22 }
  0xb0   : > { %660 = vmatpush3.bf16.msra.mxu0 %v841_v22 }
  0xb1   : > { %661 = vmatprep.subr.bf16.mxu0 %v377_v27 }
  0xb2   : > { %v422_v56 = vpop.permute.xlu0 %421 }
  0xb4   : > { %662 = vmatpush3.bf16.msra.mxu0 %v377_v27  ;;  %v427_v55 = vpop.permute.xlu1 %426 }
  0xb6   : > { %v437_v62 = vpop.permute.xlu0 %436 }
  0xb7   : > { %664 = vmatmul.mubr.msk.bf16.vlgmr.msra.gmra.mxu0 %vm449_vm8, %v713_v54 }
  0xb8   : > { %v432_v57 = vpop.permute.xlu1 %431 }
 0x177   : > { %v665_v58 = vpop.f32.mrf.mxu0 }
 0x178   : > { %v499_v59 = vadd.f32 %v665_v58, %v432_v57 }
 0x179   : > { %v490_v60 = vpop.f32.mrf.mxu0 }
 0x17a   : > { %507 = vst [vmem:[%s343_s14 + $0x10] sm:$0xff] %v499_v59  ;;  %v491_v61 = vadd.f32 %v490_v60, %v422_v56 }
 0x17b   : > { %v666_v63 = vpop.f32.mrf.mxu0 }
 0x17c   : > { %505 = vst [vmem:[%s343_s14] sm:$0xff] %v491_v61  ;;  %v502_v0 = vadd.f32 %v666_v63, %v437_v62 }
 0x17d   : > { %v493_v1 = vpop.f32.mrf.mxu0 }
 0x17e   : > { %508 = vst [vmem:[%s343_s14 + $0x18] sm:$0xff] %v502_v0  ;;  %v494_v2 = vadd.f32 %v493_v1, %v427_v55 }
 0x180   : > { %506 = vst [vmem:[%s343_s14 + $0x8] sm:$0xff] %v494_v2 }
 0x181 PF: > { %s14_s19 = sadd.s32 1, %s752_s19   ;;  %s893_s15 = smov %s740_s16 }
 0x182   : > { %p11_p10 = scmp.ge.s32.totalorder %s14_s19, 4   ;;  %s894_s16 = smov %s821_s24 }
 0x183   : > { %s895_s17 = smov %s748_s18  ;;  %s896_s18 = smov %s898_s20 }
 0x184   :  { %13 = sbr.rel (!%p11_p10) target bundleno = 3 (0x3), region = 155 }

// kernel: forward.6
= control target key start
LH: loop header
LB: loop body
LE: loop exit
PB: predicated region body
PF: predicated region fallthrough
CT: control target
= control target key end

     0   :  { %s896_s21 = smov 0   ;;  %s898_s22 = smov 0   ;;  %s1025_s0 = inlined_call_operand.vmem [shape: f32[2,16,256], index: 0, kind: input, shape index: {}, may-alias: {0,1}]   ;;  %s1026_s1 = inlined_call_operand.vmem [shape: f32[2,16,256], index: 1, kind: input, shape index: {}, may-alias: {0,1}]   ;;  %s1027_s2 = inlined_call_operand.vmem [shape: bf16[16,48], index: 2, kind: input, shape index: {}]   ;;  %s1028_s3 = inlined_call_operand.vmem [shape: f32[16,1], index: 3, kind: input, shape index: {}]   ;;  %s1029_s4 = inlined_call_operand.vmem [shape: bf16[16,48], index: 4, kind: input, shape index: {}]   ;;  %s1030_s5 = inlined_call_operand.vmem [shape: f32[16,1], index: 5, kind: input, shape index: {}]   ;;  %s1031_s6 = inlined_call_operand.vmem [shape: f32[2,16,128], index: 6, kind: output, shape index: {}]  }
   0x1   :  { %s900_s23 = smov 0   ;;  %s902_s24 = smov 0  }
   0x2   :  { %s904_s25 = smov 0  }
   0x3 LB: > { %s28_s26 = sadd.s32 1, %s849_s24  ;;  %p44_p1 = scmp.ne.s32.totalorder %s841_s22, %s837_s21  ;;  %s853_s25 = sphi %s904_s25, %s16_s25   ;;  %s849_s24 = sphi %s902_s24, %s1036_s24   ;;  %s845_s23 = sphi %s900_s23, %s1035_s23   ;;  %s841_s22 = sphi %s898_s22, %s1034_s22   ;;  %s837_s21 = sphi %s896_s21, %s1033_s21  }
   0x4   : > { %p30_p0 = scmp.ge.s32.totalorder %s28_s26, 2  ;;  %p45_p2 = scmp.eq.s32.totalorder %s853_s25, 0 }
   0x5   : > { %s37_s29 = sadd.s32 1, %s841_s22  ;;  %p728_p5 = scmp.ge.s32.totalorder %s853_s25, 2 }
   0x6   : > { %s1038_s26 = smov (%p30_p0, %s28_s26), 0  ;;  %p927_p3 = por %p45_p2, %p44_p1 }
   0x7   : > { %s32_s28 = ssub.s32 %s849_s24, %s1038_s26  ;;  %224 = sbr.rel (%p728_p5) target bundleno = 22 (0x16), region = 32 }
   0x8   : > { %p35_p4 = scmp.eq.s32.totalorder %s32_s28, 0 }
   0xa   : > { %s935_s30 = scalar_select %p35_p4, %s841_s22, %s37_s29  }
   0xc   : > { %227 = sbr.rel (!%p927_p3) target bundleno = 17 (0x11), region = 36  ;;  %s229_s7 = sand.u32 (%p927_p3), 1, %s841_s22  }
   0xd   : > { %s748_s8 = sshll.u32 (%p927_p3), %s849_s24, 5  ;;  %s729_s9 = sshll.u32 (%p927_p3), %s229_s7, 4 }
   0xe   : > { %s235_s12 = scalar_lea.vmem (%p927_p3), %s1025_s0, %s748_s8  ;;  %s231_s13 = scalar_lea.vmem (%p927_p3), [#allocation2], %s729_s9 }
   0xf   : > { %v266_v0 = vld [vmem:[%s235_s12] sm:$0xff] (%p927_p3)  ;;  %v268_v1 = vld [vmem:[%s235_s12 + $0x10] sm:$0xff] (%p927_p3) }
  0x10   : > { %267 = vst [vmem:[%s231_s13] sm:$0xff] (%p927_p3), %v266_v0  ;;  %269 = vst [vmem:[%s231_s13 + $0x8] sm:$0xff] (%p927_p3), %v268_v1 }
  0x11 PF: > { %275 = sbr.rel (!%p927_p3) target bundleno = 22 (0x16), region = 74  ;;  %s277_s14 = sand.u32 (%p927_p3), 1, %s841_s22  }
  0x12   : > { %s749_s15 = sshll.u32 (%p927_p3), %s849_s24, 5  ;;  %s732_s16 = sshll.u32 (%p927_p3), %s277_s14, 4 }
  0x13   : > { %s657_s19 = scalar_lea.vmem (%p927_p3), %s1026_s1, %s749_s15  ;;  %s279_s20 = scalar_lea.vmem (%p927_p3), [#allocation3], %s732_s16 }
  0x14   : > { %v735_v2 = vld [vmem:[%s657_s19 + $0x8] sm:$0xff] (%p927_p3)  ;;  %v736_v3 = vld [vmem:[%s657_s19 + $0x18] sm:$0xff] (%p927_p3) }
  0x15   : > { %316 = vst [vmem:[%s279_s20] sm:$0xff] (%p927_p3), %v735_v2  ;;  %318 = vst [vmem:[%s279_s20 + $0x8] sm:$0xff] (%p927_p3), %v736_v3 }
  0x16 PF: > { %p737_p6 = scmp.ge.s32.totalorder %s853_s25, 1  ;;  %p323_p7 = scmp.lt.s32.totalorder %s853_s25, 3 }
  0x18   : > { %p324_p8 = pnand %p737_p6, %p323_p7 }
  0x19   : > { %s330_s27 = sand.u32 (!%p324_p8), 1, %s837_s21   ;;  %s855_s21 = smov (!%p324_p8), 127  }
  0x1a   : > { %327 = sbr.rel (%p324_p8) target bundleno = 703 (0x2bf), region = 112  ;;  %s738_s28 = sshll.u32 (!%p324_p8), %s330_s27, 4 }
  0x1b   : > { %s332_s29 = scalar_lea.vmem (!%p324_p8), [#allocation2], %s738_s28  ;;  %s339_s7 = scalar_lea.vmem (!%p324_p8), [#allocation3], %s738_s28 }
  0x1c   : > { %s856_s8 = smov (!%p324_p8), 126   ;;  %p374_p9 = scmp.lt.s32.totalorder (!%p324_p8), %s845_s23, 1 }
  0x1f   : > { %v955_v4 = vld [vmem:[%s332_s29] sm:$0xff]  ;;  %v957_v5 = vld [vmem:[%s332_s29 + $0x8] sm:$0xff]  ;;  %v857_v18 = vmov 0   ;;  %v858_v21 = vmov 0.0|0.0   ;;  %vm415_vm4 = vcmask 1031168   ;;  %vm407_vm5 = vcmask 1039360  }
  0x20   : > { %v385_v6 = vld [vmem:[%s339_s7] sm:$0xff]  ;;  %vm387_vm0 = vcmp.ge.f32.partialorder %v955_v4, 0.0  ;;  %vm389_vm1 = vcmp.ge.f32.partialorder %v957_v5, 0.0  ;;  %v391_v7 = vmul.f32 0.1, %v955_v4  ;;  %v386_v9 = vld [vmem:[%s339_s7 + $0x8] sm:$0xff]  ;;  %474 = vmatprep.mubr.bf16.mxu0 %v857_v18  ;;  %811 = vset.pattern.permute.xlu0 %v857_v18  ;;  %v487_v30 = vlaneseq }
  0x21   : > { %v393_v8 = vmul.f32 0.1, %v957_v5  ;;  %vm388_vm2 = vcmp.ge.f32.partialorder %v385_v6, 0.0  ;;  %v392_v10 = vmul.f32 0.1, %v385_v6  ;;  %vm390_vm3 = vcmp.ge.f32.partialorder %v386_v9, 0.0  ;;  %812 = vset.pattern.permute.xlu1 %v857_v18 }
  0x22   : > { %v395_v11 = vsel %vm387_vm0, %v955_v4, %v391_v7  ;;  %v394_v13 = vmul.f32 0.1, %v386_v9  ;;  %v421_v19 = vld [vmem:[%s1028_s3] sm:$0xff]  ;;  %v422_v20 = vld [vmem:[%s1028_s3 + $0x8] sm:$0xff]  ;;  %vm438_vm6 = vcmask 392192   ;;  %v488_v31 = vand.u32 127, %v487_v30 }
  0x23   : > { %v397_v12 = vsel %vm389_vm1, %v957_v5, %v393_v8  ;;  %v396_v15 = vsel %vm388_vm2, %v385_v6, %v392_v10  ;;  %v538_v22 = vld [vmem:[%s1030_s5 + $0x8] sm:$0xff]  ;;  %v813_v29 = vld [vmem:[%s1027_s2] sm:$0xff]   ;;  %v859_v35 = vmov 0.0   ;;  %vm860_vm12 = vmmov 0   ;;  %s1040_s23 = smov (!%p374_p9, %s845_s23), 1 }
  0x24   : > { %v399_v14 = vpack.c.bf16 %v397_v12, %v395_v11  ;;  %v398_v16 = vsel %vm390_vm3, %v386_v9, %v394_v13  ;;  %v491_v32 = vadd.s32 4294967295, %v488_v31  ;;  %755 = vmatprep.subr.bf16.mxu1 %v859_v35  ;;  %761 = vmatprep.mubr.msk.bf16.mxu1 %vm860_vm12, %v859_v35  ;;  %v537_v49 = vld [vmem:[%s1030_s5] sm:$0xff]  ;;  %s750_s27 = sshll.u32 %s1040_s23, 4 }
  0x25   : > { %v400_v17 = vpack.c.bf16 %v398_v16, %v396_v15  ;;  %v814_v56 = vld [vmem:[%s1029_s4] sm:$0xff]   ;;  %s381_s7 = scalar_lea.vmem %s1031_s6, %s750_s27 }
  0x26   : > { %403 = vrot.lane.b32.xlu1 %v399_v14, %s855_s21  ;;  %411 = vrot.lane.b32.xlu0 %v399_v14, %s856_s8  ;;  %vm493_vm7 = vcmp.ge.s32.totalorder %v491_v32, 0  ;;  %vm495_vm8 = vcmp.lt.s32.totalorder %v491_v32, 32 }
  0x27   : > { %vm497_vm9 = vmand %vm493_vm7, %vm495_vm8 }
  0x2a   : > { %405 = vrot.lane.b32.xlu1 %v400_v17, %s855_s21  ;;  %413 = vrot.lane.b32.xlu0 %v400_v17, %s856_s8 }
  0x2e   : > { %425 = vperm.xlu0 %811, %v421_v19   ;;  %430 = vperm.xlu1 %812, %v422_v20  }
  0x32   : > { %531 = vrot.lane.b32.xlu0 %v858_v21, %s856_s8 }
  0x36   : > { %525 = vrot.lane.b32.xlu0 %v858_v21, %s855_s21 }
  0x3a   : > { %546 = vperm.xlu0 %811, %v538_v22  }
  0x3e   : > { %604 = vrot.lane.b32.xlu0 %v385_v6, %s856_s8 }
  0x42   : > { %608 = vrot.lane.b32.xlu0 %v386_v9, %s856_s8 }
  0x98   : > { %v404_v23 = vpop.permute.xlu1 %403  ;;  %v412_v24 = vpop.permute.xlu0 %411 }
  0x9c   : > { %v414_v25 = vpop.permute.xlu0 %413  ;;  %v406_v27 = vpop.permute.xlu1 %405 }
  0x9d   : > { %452 = vmatprep.subr.bf16.mxu0 %v414_v25  ;;  %v416_v26 = vsel %vm415_vm4, %v412_v24, %v414_v25  ;;  %v408_v28 = vsel %vm407_vm5, %v404_v23, %v406_v27 }
  0x9e   : > { %453 = vmatpush1.bf16.msra.mxu0 %v416_v26 }
  0x9f   : > { %454 = vmatprep.subr.bf16.mxu0 %v406_v27 }
  0xa2   : > { %455 = vmatpush1.bf16.msra.mxu0 %v408_v28 }
  0xa3   : > { %456 = vmatprep.subr.bf16.mxu0 %v400_v17 }
  0xa6   : > { %457 = vmatpush1.bf16.msra.mxu0 %v399_v14 }
  0xa9   : > { %743 = vmatmul.mubr.msk.bf16.vlgmr.msra.gmra.mxu0 %vm438_vm6, %v813_v29  ;;  %v426_v33 = vpop.permute.xlu0 %425  ;;  %v431_v38 = vpop.permute.xlu1 %430 }
  0xad   : > { %v532_v50 = vpop.permute.xlu0 %531 }
  0xb1   : > { %v526_v53 = vpop.permute.xlu0 %525 }
  0xb5   : > { %v547_v57 = vpop.permute.xlu0 %546 }
  0xb9   : > { %v605_v60 = vpop.permute.xlu0 %604 }
  0xbd   : > { %v609_v1 = vpop.permute.xlu0 %608 }
 0x169   : > { %v476_v34 = vpop.f32.mrf.mxu0 }
 0x16a   : > { %v477_v36 = vadd.f32 %v476_v34, %v426_v33 }
 0x16b   : > { %v478_v37 = vpop.f32.mrf.mxu0 }
 0x16c   : > { %v503_v39 = vsel %vm497_vm9, %v477_v36, 0.0 }
 0x16d   : > { %v480_v40 = vpop.f32.mrf.mxu0  ;;  %v511_v42 = vmul.f32 0.1, %v503_v39  ;;  %vm507_vm10 = vcmp.ge.f32.partialorder %v503_v39, 0.0 }
 0x16e   : > { %v481_v41 = vadd.f32 %v480_v40, %v431_v38 }
 0x16f   : > { %v482_v43 = vpop.f32.mrf.mxu0  ;;  %v515_v46 = vsel %vm507_vm10, %v503_v39, %v511_v42 }
 0x170   : > { %v505_v44 = vsel %vm497_vm9, %v481_v41, 0.0 }
 0x171   : > { %vm509_vm11 = vcmp.ge.f32.partialorder %v505_v44, 0.0  ;;  %v513_v45 = vmul.f32 0.1, %v505_v44 }
 0x173   : > { %v517_v47 = vsel %vm509_vm11, %v505_v44, %v513_v45 }
 0x174   : > { %v519_v48 = vpack.c.bf16 %v517_v47, %v515_v46 }
 0x176   : > { %529 = vrot.lane.b32.xlu1 %v519_v48, %s856_s8 }
 0x17a   : > { %523 = vrot.lane.b32.xlu1 %v519_v48, %s855_s21 }
 0x17e   : > { %541 = vperm.xlu1 %812, %v537_v49  }
 0x182   : > { %602 = vrot.lane.b32.xlu1 %v955_v4, %s856_s8 }
 0x186   : > { %606 = vrot.lane.b32.xlu1 %v957_v5, %s856_s8 }
 0x1e8   : > { %v530_v51 = vpop.permute.xlu1 %529 }
 0x1e9   : > { %v533_v52 = vsel %vm415_vm4, %v530_v51, %v532_v50 }
 0x1ea   : > { %756 = vmatpush3.bf16.msra.mxu1 %v533_v52 }
 0x1eb   : > { %757 = vmatprep.subr.bf16.mxu1 %v859_v35 }
 0x1ec   : > { %v524_v54 = vpop.permute.xlu1 %523 }
 0x1ed   : > { %v527_v55 = vsel %vm407_vm5, %v524_v54, %v526_v53 }
 0x1ee   : > { %758 = vmatpush3.bf16.msra.mxu1 %v527_v55 }
 0x1ef   : > { %759 = vmatprep.subr.bf16.mxu1 %v859_v35 }
 0x1f2   : > { %760 = vmatpush3.bf16.msra.mxu1 %v519_v48 }
 0x1f5   : > { %762 = vmatmul.mubr.msk.bf16.vlgmr.msra.gmra.mxu1 %vm438_vm6, %v814_v56 }
 0x1f9   : > { %v542_v58 = vpop.permute.xlu1 %541 }
 0x1fd   : > { %v603_v59 = vpop.permute.xlu1 %602 }
 0x1fe   : > { %v611_v62 = vsel %vm415_vm4, %v603_v59, %v605_v60 }
 0x201   : > { %v607_v0 = vpop.permute.xlu1 %606 }
 0x202   : > { %v612_v5 = vsel %vm415_vm4, %v607_v0, %v609_v1 }
 0x2b5   : > { %v591_v61 = vpop.f32.mrf.mxu1 }
 0x2b6   : > { %v592_v63 = vadd.f32 %v591_v61, %v542_v58 }
 0x2b7   : > { %v763_v2 = vpop.f32.mrf.mxu1 }
 0x2b8   : > { %v615_v3 = vadd.f32 %v611_v62, %v592_v63 }
 0x2b9   : > { %v594_v4 = vpop.f32.mrf.mxu1 }
 0x2ba   : > { %617 = vst [vmem:[%s381_s7] sm:$0xff] %v615_v3  ;;  %v595_v6 = vadd.f32 %v594_v4, %v547_v57 }
 0x2bb   : > { %v764_v7 = vpop.f32.mrf.mxu1 }
 0x2bc   : > { %v616_v8 = vadd.f32 %v612_v5, %v595_v6 }
 0x2be   : > { %618 = vst [vmem:[%s381_s7 + $0x8] sm:$0xff] %v616_v8 }
 0x2bf PF: > { %s16_s25 = sadd.s32 1, %s853_s25   ;;  %s1033_s21 = smov %s841_s22 }
 0x2c0   : > { %p13_p10 = scmp.ge.s32.totalorder %s16_s25, 4   ;;  %s1034_s22 = smov %s935_s30 }
 0x2c1   : > { %s1035_s23 = smov %s849_s24  ;;  %s1036_s24 = smov %s1038_s26 }
 0x2c2   :  { %15 = sbr.rel (!%p13_p10) target bundleno = 3 (0x3), region = 163 }

// kernel: forward.7
= control target key start
LH: loop header
LB: loop body
LE: loop exit
PB: predicated region body
PF: predicated region fallthrough
CT: control target
= control target key end

     0   :  { %s904_s21 = smov 0   ;;  %s906_s22 = smov 0   ;;  %s1031_s0 = inlined_call_operand.vmem [shape: f32[2,16,256], index: 0, kind: input, shape index: {}, may-alias: {0,1}]   ;;  %s1032_s1 = inlined_call_operand.vmem [shape: f32[2,16,256], index: 1, kind: input, shape index: {}, may-alias: {0,1}]   ;;  %s1033_s2 = inlined_call_operand.vmem [shape: bf16[16,48], index: 2, kind: input, shape index: {}]   ;;  %s1034_s3 = inlined_call_operand.vmem [shape: f32[16,1], index: 3, kind: input, shape index: {}]   ;;  %s1035_s4 = inlined_call_operand.vmem [shape: bf16[16,48], index: 4, kind: input, shape index: {}]   ;;  %s1036_s5 = inlined_call_operand.vmem [shape: f32[16,1], index: 5, kind: input, shape index: {}]   ;;  %s1037_s6 = inlined_call_operand.vmem [shape: f32[2,16,128], index: 6, kind: output, shape index: {}]  }
   0x1   :  { %s908_s23 = smov 0   ;;  %s910_s24 = smov 0  }
   0x2   :  { %s912_s25 = smov 0  }
   0x3 LB: > { %s28_s26 = sadd.s32 1, %s854_s24  ;;  %p44_p1 = scmp.ne.s32.totalorder %s846_s22, %s842_s21  ;;  %s858_s25 = sphi %s912_s25, %s16_s25   ;;  %s854_s24 = sphi %s910_s24, %s1042_s24   ;;  %s850_s23 = sphi %s908_s23, %s1041_s23   ;;  %s846_s22 = sphi %s906_s22, %s1040_s22   ;;  %s842_s21 = sphi %s904_s21, %s1039_s21  }
   0x4   : > { %p30_p0 = scmp.ge.s32.totalorder %s28_s26, 2  ;;  %p45_p2 = scmp.eq.s32.totalorder %s858_s25, 0 }
   0x5   : > { %s37_s29 = sadd.s32 1, %s846_s22  ;;  %p730_p5 = scmp.ge.s32.totalorder %s858_s25, 2 }
   0x6   : > { %s1044_s26 = smov (%p30_p0, %s28_s26), 0  ;;  %p935_p3 = por %p45_p2, %p44_p1 }
   0x7   : > { %s32_s28 = ssub.s32 %s854_s24, %s1044_s26  ;;  %224 = sbr.rel (%p730_p5) target bundleno = 22 (0x16), region = 32 }
   0x8   : > { %p35_p4 = scmp.eq.s32.totalorder %s32_s28, 0 }
   0xa   : > { %s943_s30 = scalar_select %p35_p4, %s846_s22, %s37_s29  }
   0xc   : > { %227 = sbr.rel (!%p935_p3) target bundleno = 17 (0x11), region = 36  ;;  %s229_s7 = sand.u32 (%p935_p3), 1, %s846_s22  }
   0xd   : > { %s750_s8 = sshll.u32 (%p935_p3), %s854_s24, 5  ;;  %s731_s9 = sshll.u32 (%p935_p3), %s229_s7, 4 }
   0xe   : > { %s235_s12 = scalar_lea.vmem (%p935_p3), %s1031_s0, %s750_s8  ;;  %s231_s13 = scalar_lea.vmem (%p935_p3), [#allocation2], %s731_s9 }
   0xf   : > { %v266_v0 = vld [vmem:[%s235_s12] sm:$0xff] (%p935_p3)  ;;  %v268_v1 = vld [vmem:[%s235_s12 + $0x10] sm:$0xff] (%p935_p3) }
  0x10   : > { %267 = vst [vmem:[%s231_s13] sm:$0xff] (%p935_p3), %v266_v0  ;;  %269 = vst [vmem:[%s231_s13 + $0x8] sm:$0xff] (%p935_p3), %v268_v1 }
  0x11 PF: > { %275 = sbr.rel (!%p935_p3) target bundleno = 22 (0x16), region = 74  ;;  %s277_s14 = sand.u32 (%p935_p3), 1, %s846_s22  }
  0x12   : > { %s751_s15 = sshll.u32 (%p935_p3), %s854_s24, 5  ;;  %s734_s16 = sshll.u32 (%p935_p3), %s277_s14, 4 }
  0x13   : > { %s659_s19 = scalar_lea.vmem (%p935_p3), %s1032_s1, %s751_s15  ;;  %s279_s20 = scalar_lea.vmem (%p935_p3), [#allocation3], %s734_s16 }
  0x14   : > { %v737_v2 = vld [vmem:[%s659_s19 + $0x8] sm:$0xff] (%p935_p3)  ;;  %v738_v3 = vld [vmem:[%s659_s19 + $0x18] sm:$0xff] (%p935_p3) }
  0x15   : > { %316 = vst [vmem:[%s279_s20] sm:$0xff] (%p935_p3), %v737_v2  ;;  %318 = vst [vmem:[%s279_s20 + $0x8] sm:$0xff] (%p935_p3), %v738_v3 }
  0x16 PF: > { %p739_p6 = scmp.ge.s32.totalorder %s858_s25, 1  ;;  %p323_p7 = scmp.lt.s32.totalorder %s858_s25, 3 }
  0x18   : > { %p324_p8 = pnand %p739_p6, %p323_p7 }
  0x19   : > { %s330_s27 = sand.u32 (!%p324_p8), 1, %s842_s21   ;;  %s860_s21 = smov (!%p324_p8), 125  }
  0x1a   : > { %327 = sbr.rel (%p324_p8) target bundleno = 703 (0x2bf), region = 112  ;;  %s740_s28 = sshll.u32 (!%p324_p8), %s330_s27, 4 }
  0x1b   : > { %s332_s29 = scalar_lea.vmem (!%p324_p8), [#allocation2], %s740_s28  ;;  %s339_s7 = scalar_lea.vmem (!%p324_p8), [#allocation3], %s740_s28 }
  0x1c   : > { %s861_s8 = smov (!%p324_p8), 122   ;;  %s864_s13 = smov (!%p324_p8), 126  }
  0x1d   : > { %s865_s14 = smov (!%p324_p8), 127   ;;  %s868_s19 = smov (!%p324_p8), 124  }
  0x1e   : > { %p374_p9 = scmp.lt.s32.totalorder (!%p324_p8), %s850_s23, 1 }
  0x1f   : > { %v963_v4 = vld [vmem:[%s332_s29] sm:$0xff]  ;;  %v965_v5 = vld [vmem:[%s332_s29 + $0x8] sm:$0xff]  ;;  %v862_v18 = vmov 0   ;;  %v863_v21 = vmov 0.0|0.0   ;;  %vm415_vm4 = vcmask 998400   ;;  %vm407_vm5 = vcmask 1022976  }
  0x20   : > { %v967_v6 = vld [vmem:[%s339_s7] sm:$0xff]  ;;  %vm387_vm0 = vcmp.ge.f32.partialorder %v963_v4, 0.0  ;;  %vm389_vm1 = vcmp.ge.f32.partialorder %v965_v5, 0.0  ;;  %v391_v7 = vmul.f32 0.1, %v963_v4  ;;  %v973_v9 = vld [vmem:[%s339_s7 + $0x8] sm:$0xff]  ;;  %474 = vmatprep.mubr.bf16.mxu0 %v862_v18  ;;  %816 = vset.pattern.permute.xlu0 %v862_v18  ;;  %v487_v30 = vlaneseq }
  0x21   : > { %v393_v8 = vmul.f32 0.1, %v965_v5  ;;  %vm388_vm2 = vcmp.ge.f32.partialorder %v967_v6, 0.0  ;;  %v392_v10 = vmul.f32 0.1, %v967_v6  ;;  %vm390_vm3 = vcmp.ge.f32.partialorder %v973_v9, 0.0  ;;  %817 = vset.pattern.permute.xlu1 %v862_v18 }
  0x22   : > { %v395_v11 = vsel %vm387_vm0, %v963_v4, %v391_v7  ;;  %v394_v13 = vmul.f32 0.1, %v973_v9  ;;  %v421_v19 = vld [vmem:[%s1034_s3] sm:$0xff]  ;;  %v422_v20 = vld [vmem:[%s1034_s3 + $0x8] sm:$0xff]  ;;  %vm438_vm6 = vcmask 392192   ;;  %v488_v31 = vand.u32 127, %v487_v30 }
  0x23   : > { %v397_v12 = vsel %vm389_vm1, %v965_v5, %v393_v8  ;;  %v396_v15 = vsel %vm388_vm2, %v967_v6, %v392_v10  ;;  %v540_v22 = vld [vmem:[%s1036_s5 + $0x8] sm:$0xff]  ;;  %v818_v29 = vld [vmem:[%s1033_s2] sm:$0xff]   ;;  %v866_v35 = vmov 0.0   ;;  %vm867_vm12 = vmmov 0   ;;  %s1046_s23 = smov (!%p374_p9, %s850_s23), 1 }
  0x24   : > { %v399_v14 = vpack.c.bf16 %v397_v12, %v395_v11  ;;  %v398_v16 = vsel %vm390_vm3, %v973_v9, %v394_v13  ;;  %v491_v32 = vadd.s32 4294967295, %v488_v31  ;;  %757 = vmatprep.subr.bf16.mxu1 %v866_v35  ;;  %763 = vmatprep.mubr.msk.bf16.mxu1 %vm867_vm12, %v866_v35  ;;  %v539_v49 = vld [vmem:[%s1036_s5] sm:$0xff]  ;;  %vm534_vm13 = vcmask 1031168   ;;  %s752_s7 = sshll.u32 %s1046_s23, 4 }
  0x25   : > { %v400_v17 = vpack.c.bf16 %v398_v16, %v396_v15  ;;  %vm527_vm14 = vcmask 1039360   ;;  %v819_v56 = vld [vmem:[%s1035_s4] sm:$0xff]   ;;  %vm612_vm15 = vcmask 1014784   ;;  %s381_s9 = scalar_lea.vmem %s1037_s6, %s752_s7 }
  0x26   : > { %403 = vrot.lane.b32.xlu1 %v399_v14, %s860_s21  ;;  %411 = vrot.lane.b32.xlu0 %v399_v14, %s861_s8  ;;  %vm493_vm7 = vcmp.ge.s32.totalorder %v491_v32, 0  ;;  %vm495_vm8 = vcmp.lt.s32.totalorder %v491_v32, 32 }
  0x27   : > { %vm497_vm9 = vmand %vm493_vm7, %vm495_vm8 }
  0x2a   : > { %405 = vrot.lane.b32.xlu1 %v400_v17, %s860_s21  ;;  %413 = vrot.lane.b32.xlu0 %v400_v17, %s861_s8 }
  0x2e   : > { %425 = vperm.xlu0 %816, %v421_v19   ;;  %430 = vperm.xlu1 %817, %v422_v20  }
  0x32   : > { %532 = vrot.lane.b32.xlu0 %v863_v21, %s864_s13 }
  0x36   : > { %525 = vrot.lane.b32.xlu0 %v863_v21, %s865_s14 }
  0x3a   : > { %548 = vperm.xlu0 %816, %v540_v22  }
  0x3e   : > { %606 = vrot.lane.b32.xlu0 %v967_v6, %s868_s19 }
  0x42   : > { %610 = vrot.lane.b32.xlu0 %v973_v9, %s868_s19 }
  0x98   : > { %v404_v23 = vpop.permute.xlu1 %403  ;;  %v412_v24 = vpop.permute.xlu0 %411 }
  0x9c   : > { %v414_v25 = vpop.permute.xlu0 %413  ;;  %v406_v27 = vpop.permute.xlu1 %405 }
  0x9d   : > { %452 = vmatprep.subr.bf16.mxu0 %v414_v25  ;;  %v416_v26 = vsel %vm415_vm4, %v412_v24, %v414_v25  ;;  %v408_v28 = vsel %vm407_vm5, %v404_v23, %v406_v27 }
  0x9e   : > { %453 = vmatpush1.bf16.msra.mxu0 %v416_v26 }
  0x9f   : > { %454 = vmatprep.subr.bf16.mxu0 %v406_v27 }
  0xa2   : > { %455 = vmatpush1.bf16.msra.mxu0 %v408_v28 }
  0xa3   : > { %456 = vmatprep.subr.bf16.mxu0 %v400_v17 }
  0xa6   : > { %457 = vmatpush1.bf16.msra.mxu0 %v399_v14 }
  0xa9   : > { %745 = vmatmul.mubr.msk.bf16.vlgmr.msra.gmra.mxu0 %vm438_vm6, %v818_v29  ;;  %v426_v33 = vpop.permute.xlu0 %425  ;;  %v431_v38 = vpop.permute.xlu1 %430 }
  0xad   : > { %v533_v50 = vpop.permute.xlu0 %532 }
  0xb1   : > { %v526_v53 = vpop.permute.xlu0 %525 }
  0xb5   : > { %v549_v57 = vpop.permute.xlu0 %548 }
  0xb9   : > { %v607_v60 = vpop.permute.xlu0 %606 }
  0xbd   : > { %v611_v1 = vpop.permute.xlu0 %610 }
 0x169   : > { %v476_v34 = vpop.f32.mrf.mxu0 }
 0x16a   : > { %v477_v36 = vadd.f32 %v476_v34, %v426_v33 }
 0x16b   : > { %v478_v37 = vpop.f32.mrf.mxu0 }
 0x16c   : > { %v503_v39 = vsel %vm497_vm9, %v477_v36, 0.0 }
 0x16d   : > { %v480_v40 = vpop.f32.mrf.mxu0  ;;  %v511_v42 = vmul.f32 0.1, %v503_v39  ;;  %vm507_vm10 = vcmp.ge.f32.partialorder %v503_v39, 0.0 }
 0x16e   : > { %v481_v41 = vadd.f32 %v480_v40, %v431_v38 }
 0x16f   : > { %v482_v43 = vpop.f32.mrf.mxu0  ;;  %v515_v46 = vsel %vm507_vm10, %v503_v39, %v511_v42 }
 0x170   : > { %v505_v44 = vsel %vm497_vm9, %v481_v41, 0.0 }
 0x171   : > { %vm509_vm11 = vcmp.ge.f32.partialorder %v505_v44, 0.0  ;;  %v513_v45 = vmul.f32 0.1, %v505_v44 }
 0x173   : > { %v517_v47 = vsel %vm509_vm11, %v505_v44, %v513_v45 }
 0x174   : > { %v519_v48 = vpack.c.bf16 %v517_v47, %v515_v46 }
 0x176   : > { %530 = vrot.lane.b32.xlu1 %v519_v48, %s864_s13 }
 0x17a   : > { %523 = vrot.lane.b32.xlu1 %v519_v48, %s865_s14 }
 0x17e   : > { %543 = vperm.xlu1 %817, %v539_v49  }
 0x182   : > { %604 = vrot.lane.b32.xlu1 %v963_v4, %s868_s19 }
 0x186   : > { %608 = vrot.lane.b32.xlu1 %v965_v5, %s868_s19 }
 0x1e8   : > { %v531_v51 = vpop.permute.xlu1 %530 }
 0x1e9   : > { %v535_v52 = vsel %vm534_vm13, %v531_v51, %v533_v50 }
 0x1ea   : > { %758 = vmatpush3.bf16.msra.mxu1 %v535_v52 }
 0x1eb   : > { %759 = vmatprep.subr.bf16.mxu1 %v866_v35 }
 0x1ec   : > { %v524_v54 = vpop.permute.xlu1 %523 }
 0x1ed   : > { %v528_v55 = vsel %vm527_vm14, %v524_v54, %v526_v53 }
 0x1ee   : > { %760 = vmatpush3.bf16.msra.mxu1 %v528_v55 }
 0x1ef   : > { %761 = vmatprep.subr.bf16.mxu1 %v866_v35 }
 0x1f2   : > { %762 = vmatpush3.bf16.msra.mxu1 %v519_v48 }
 0x1f5   : > { %764 = vmatmul.mubr.msk.bf16.vlgmr.msra.gmra.mxu1 %vm438_vm6, %v819_v56 }
 0x1f9   : > { %v544_v58 = vpop.permute.xlu1 %543 }
 0x1fd   : > { %v605_v59 = vpop.permute.xlu1 %604 }
 0x1fe   : > { %v613_v62 = vsel %vm612_vm15, %v605_v59, %v607_v60 }
 0x201   : > { %v609_v0 = vpop.permute.xlu1 %608 }
 0x202   : > { %v614_v5 = vsel %vm612_vm15, %v609_v0, %v611_v1 }
 0x2b5   : > { %v593_v61 = vpop.f32.mrf.mxu1 }
 0x2b6   : > { %v594_v63 = vadd.f32 %v593_v61, %v544_v58 }
 0x2b7   : > { %v765_v2 = vpop.f32.mrf.mxu1 }
 0x2b8   : > { %v617_v3 = vadd.f32 %v613_v62, %v594_v63 }
 0x2b9   : > { %v596_v4 = vpop.f32.mrf.mxu1 }
 0x2ba   : > { %619 = vst [vmem:[%s381_s9] sm:$0xff] %v617_v3  ;;  %v597_v6 = vadd.f32 %v596_v4, %v549_v57 }
 0x2bb   : > { %v766_v7 = vpop.f32.mrf.mxu1 }
 0x2bc   : > { %v618_v8 = vadd.f32 %v614_v5, %v597_v6 }
 0x2be   : > { %620 = vst [vmem:[%s381_s9 + $0x8] sm:$0xff] %v618_v8 }
 0x2bf PF: > { %s16_s25 = sadd.s32 1, %s858_s25   ;;  %s1039_s21 = smov %s846_s22 }
 0x2c0   : > { %p13_p10 = scmp.ge.s32.totalorder %s16_s25, 4   ;;  %s1040_s22 = smov %s943_s30 }
 0x2c1   : > { %s1041_s23 = smov %s854_s24  ;;  %s1042_s24 = smov %s1044_s26 }
 0x2c2   :  { %15 = sbr.rel (!%p13_p10) target bundleno = 3 (0x3), region = 163 }

// kernel: forward.8
= control target key start
LH: loop header
LB: loop body
LE: loop exit
PB: predicated region body
PF: predicated region fallthrough
CT: control target
= control target key end

     0   :  { %s972_s21 = smov 0   ;;  %s974_s22 = smov 0   ;;  %s1143_s0 = inlined_call_operand.vmem [shape: f32[2,16,256], index: 0, kind: input, shape index: {}, may-alias: {0,1}]   ;;  %s1144_s1 = inlined_call_operand.vmem [shape: f32[2,16,256], index: 1, kind: input, shape index: {}, may-alias: {0,1}]   ;;  %s1145_s2 = inlined_call_operand.vmem [shape: bf16[16,112], index: 2, kind: input, shape index: {}]   ;;  %s1146_s3 = inlined_call_operand.vmem [shape: f32[16,1], index: 3, kind: input, shape index: {}]   ;;  %s1147_s4 = inlined_call_operand.vmem [shape: bf16[16,112], index: 4, kind: input, shape index: {}]   ;;  %s1148_s5 = inlined_call_operand.vmem [shape: f32[16,1], index: 5, kind: input, shape index: {}]   ;;  %s1149_s6 = inlined_call_operand.vmem [shape: f32[2,16,128], index: 6, kind: output, shape index: {}]  }
   0x1   :  { %s976_s23 = smov 0   ;;  %s978_s24 = smov 0  }
   0x2   :  { %s980_s25 = smov 0  }
   0x3 LB: > { %s28_s26 = sadd.s32 1, %s921_s24  ;;  %p44_p1 = scmp.ne.s32.totalorder %s913_s22, %s909_s21  ;;  %s925_s25 = sphi %s980_s25, %s16_s25   ;;  %s921_s24 = sphi %s978_s24, %s1154_s24   ;;  %s917_s23 = sphi %s976_s23, %s1153_s23   ;;  %s913_s22 = sphi %s974_s22, %s1152_s22   ;;  %s909_s21 = sphi %s972_s21, %s1151_s21  }
   0x4   : > { %p30_p0 = scmp.ge.s32.totalorder %s28_s26, 2  ;;  %p45_p2 = scmp.eq.s32.totalorder %s925_s25, 0 }
   0x5   : > { %s37_s29 = sadd.s32 1, %s913_s22  ;;  %p784_p5 = scmp.ge.s32.totalorder %s925_s25, 2 }
   0x6   : > { %s1156_s26 = smov (%p30_p0, %s28_s26), 0  ;;  %p1003_p3 = por %p45_p2, %p44_p1 }
   0x7   : > { %s32_s28 = ssub.s32 %s921_s24, %s1156_s26  ;;  %224 = sbr.rel (%p784_p5) target bundleno = 22 (0x16), region = 32 }
   0x8   : > { %p35_p4 = scmp.eq.s32.totalorder %s32_s28, 0 }
   0xa   : > { %s1011_s30 = scalar_select %p35_p4, %s913_s22, %s37_s29  }
   0xc   : > { %227 = sbr.rel (!%p1003_p3) target bundleno = 17 (0x11), region = 36  ;;  %s229_s7 = sand.u32 (%p1003_p3), 1, %s913_s22  }
   0xd   : > { %s804_s8 = sshll.u32 (%p1003_p3), %s921_s24, 5  ;;  %s785_s9 = sshll.u32 (%p1003_p3), %s229_s7, 4 }
   0xe   : > { %s235_s12 = scalar_lea.vmem (%p1003_p3), %s1143_s0, %s804_s8  ;;  %s231_s13 = scalar_lea.vmem (%p1003_p3), [#allocation2], %s785_s9 }
   0xf   : > { %v266_v0 = vld [vmem:[%s235_s12] sm:$0xff] (%p1003_p3)  ;;  %v268_v1 = vld [vmem:[%s235_s12 + $0x10] sm:$0xff] (%p1003_p3) }
  0x10   : > { %267 = vst [vmem:[%s231_s13] sm:$0xff] (%p1003_p3), %v266_v0  ;;  %269 = vst [vmem:[%s231_s13 + $0x8] sm:$0xff] (%p1003_p3), %v268_v1 }
  0x11 PF: > { %275 = sbr.rel (!%p1003_p3) target bundleno = 22 (0x16), region = 74  ;;  %s277_s14 = sand.u32 (%p1003_p3), 1, %s913_s22  }
  0x12   : > { %s805_s15 = sshll.u32 (%p1003_p3), %s921_s24, 5  ;;  %s788_s16 = sshll.u32 (%p1003_p3), %s277_s14, 4 }
  0x13   : > { %s713_s19 = scalar_lea.vmem (%p1003_p3), %s1144_s1, %s805_s15  ;;  %s279_s20 = scalar_lea.vmem (%p1003_p3), [#allocation3], %s788_s16 }
  0x14   : > { %v791_v2 = vld [vmem:[%s713_s19 + $0x8] sm:$0xff] (%p1003_p3)  ;;  %v792_v3 = vld [vmem:[%s713_s19 + $0x18] sm:$0xff] (%p1003_p3) }
  0x15   : > { %316 = vst [vmem:[%s279_s20] sm:$0xff] (%p1003_p3), %v791_v2  ;;  %318 = vst [vmem:[%s279_s20 + $0x8] sm:$0xff] (%p1003_p3), %v792_v3 }
  0x16 PF: > { %p793_p6 = scmp.ge.s32.totalorder %s925_s25, 1  ;;  %p323_p7 = scmp.lt.s32.totalorder %s925_s25, 3 }
  0x18   : > { %p324_p8 = pnand %p793_p6, %p323_p7 }
  0x19   : > { %s330_s27 = sand.u32 (!%p324_p8), 1, %s909_s21   ;;  %s927_s21 = smov (!%p324_p8), 123  }
  0x1a   : > { %327 = sbr.rel (%p324_p8) target bundleno = 735 (0x2df), region = 112  ;;  %s794_s28 = sshll.u32 (!%p324_p8), %s330_s27, 4 }
  0x1b   : > { %s332_s29 = scalar_lea.vmem (!%p324_p8), [#allocation2], %s794_s28  ;;  %s339_s7 = scalar_lea.vmem (!%p324_p8), [#allocation3], %s794_s28 }
  0x1c   : > { %s928_s8 = smov (!%p324_p8), 122   ;;  %s929_s9 = smov (!%p324_p8), 124  }
  0x1d   : > { %s930_s10 = smov (!%p324_p8), 125   ;;  %s931_s11 = smov (!%p324_p8), 126  }
  0x1e   : > { %s933_s12 = smov (!%p324_p8), 127   ;;  %p374_p9 = scmp.lt.s32.totalorder (!%p324_p8), %s917_s23, 1 }
  0x1f   : > { %v1031_v4 = vld [vmem:[%s332_s29] sm:$0xff]  ;;  %v1033_v5 = vld [vmem:[%s332_s29 + $0x8] sm:$0xff]  ;;  %v932_v18 = vmov 0   ;;  %v934_v21 = vmov 0.0|0.0   ;;  %vm447_vm4 = vcmask 998400   ;;  %vm439_vm5 = vcmask 1006592  }
  0x20   : > { %v385_v6 = vld [vmem:[%s339_s7] sm:$0xff]  ;;  %vm387_vm0 = vcmp.ge.f32.partialorder %v1031_v4, 0.0  ;;  %vm389_vm1 = vcmp.ge.f32.partialorder %v1033_v5, 0.0  ;;  %v391_v7 = vmul.f32 0.1, %v1031_v4  ;;  %v386_v9 = vld [vmem:[%s339_s7 + $0x8] sm:$0xff]  ;;  %506 = vmatprep.mubr.bf16.mxu0 %v932_v18  ;;  %883 = vset.pattern.permute.xlu0 %v932_v18  ;;  %v519_v42 = vlaneseq }
  0x21   : > { %v393_v8 = vmul.f32 0.1, %v1033_v5  ;;  %vm388_vm2 = vcmp.ge.f32.partialorder %v385_v6, 0.0  ;;  %v392_v10 = vmul.f32 0.1, %v385_v6  ;;  %vm390_vm3 = vcmp.ge.f32.partialorder %v386_v9, 0.0  ;;  %884 = vset.pattern.permute.xlu1 %v932_v18 }
  0x22   : > { %v395_v11 = vsel %vm387_vm0, %v1031_v4, %v391_v7  ;;  %v394_v13 = vmul.f32 0.1, %v386_v9  ;;  %v453_v19 = vld [vmem:[%s1146_s3] sm:$0xff]  ;;  %v454_v20 = vld [vmem:[%s1146_s3 + $0x8] sm:$0xff]  ;;  %vm431_vm6 = vcmask 1014784   ;;  %vm423_vm7 = vcmask 1022976  }
  0x23   : > { %v397_v12 = vsel %vm389_vm1, %v1033_v5, %v393_v8  ;;  %v396_v15 = vsel %vm388_vm2, %v385_v6, %v392_v10  ;;  %v594_v22 = vld [vmem:[%s1148_s5 + $0x8] sm:$0xff]  ;;  %vm415_vm8 = vcmask 1031168   ;;  %vm407_vm9 = vcmask 1039360   ;;  %v885_v41 = vld [vmem:[%s1145_s2] sm:$0xff]   ;;  %s1158_s23 = smov (!%p374_p9, %s917_s23), 1 }
  0x24   : > { %v1041_v14 = vpack.c.bf16 %v397_v12, %v395_v11  ;;  %v398_v16 = vsel %vm390_vm3, %v386_v9, %v394_v13  ;;  %vm470_vm10 = vcmask 916480   ;;  %v520_v43 = vand.u32 127, %v519_v42  ;;  %v593_v61 = vld [vmem:[%s1148_s5] sm:$0xff] }
  0x25   : > { %v1047_v17 = vpack.c.bf16 %v398_v16, %v396_v15  ;;  %v935_v47 = vmov 0.0   ;;  %vm936_vm0 = vmmov 0   ;;  %v886_v16 = vld [vmem:[%s1147_s4] sm:$0xff]  }
  0x26   : > { %435 = vrot.lane.b32.xlu1 %v1041_v14, %s927_s21  ;;  %443 = vrot.lane.b32.xlu0 %v1041_v14, %s928_s8  ;;  %v523_v44 = vadd.s32 4294967293, %v520_v43 }
  0x27   : > { %815 = vmatprep.subr.bf16.mxu1 %v935_v47  ;;  %829 = vmatprep.mubr.msk.bf16.mxu1 %vm936_vm0, %v935_v47 }
  0x28   : > { %vm525_vm11 = vcmp.ge.s32.totalorder %v523_v44, 0  ;;  %vm527_vm12 = vcmp.lt.s32.totalorder %v523_v44, 32 }
  0x29   : > { %vm529_vm13 = vmand %vm525_vm11, %vm527_vm12 }
  0x2a   : > { %437 = vrot.lane.b32.xlu1 %v1047_v17, %s927_s21  ;;  %445 = vrot.lane.b32.xlu0 %v1047_v17, %s928_s8 }
  0x2e   : > { %429 = vrot.lane.b32.xlu1 %v1047_v17, %s929_s9  ;;  %427 = vrot.lane.b32.xlu0 %v1041_v14, %s929_s9 }
  0x32   : > { %421 = vrot.lane.b32.xlu1 %v1047_v17, %s930_s10  ;;  %419 = vrot.lane.b32.xlu0 %v1041_v14, %s930_s10 }
  0x36   : > { %413 = vrot.lane.b32.xlu1 %v1047_v17, %s931_s11  ;;  %411 = vrot.lane.b32.xlu0 %v1041_v14, %s931_s11 }
  0x3a   : > { %405 = vrot.lane.b32.xlu1 %v1047_v17, %s933_s12  ;;  %403 = vrot.lane.b32.xlu0 %v1041_v14, %s933_s12 }
  0x3e   : > { %457 = vperm.xlu0 %883, %v453_v19   ;;  %462 = vperm.xlu1 %884, %v454_v20  }
  0x42   : > { %587 = vrot.lane.b32.xlu0 %v934_v21, %s928_s8 }
  0x46   : > { %581 = vrot.lane.b32.xlu0 %v934_v21, %s927_s21 }
  0x4a   : > { %575 = vrot.lane.b32.xlu0 %v934_v21, %s929_s9 }
  0x4e   : > { %569 = vrot.lane.b32.xlu0 %v934_v21, %s930_s10 }
  0x52   : > { %563 = vrot.lane.b32.xlu0 %v934_v21, %s931_s11 }
  0x56   : > { %557 = vrot.lane.b32.xlu0 %v934_v21, %s933_s12 }
  0x5a   : > { %602 = vperm.xlu0 %883, %v594_v22  }
  0x5e   : > { %660 = vrot.lane.b32.xlu0 %v385_v6, %s928_s8 }
  0x62   : > { %664 = vrot.lane.b32.xlu0 %v386_v9, %s928_s8 }
  0x98   : > { %v436_v23 = vpop.permute.xlu1 %435  ;;  %v444_v24 = vpop.permute.xlu0 %443 }
  0x9c   : > { %v438_v25 = vpop.permute.xlu1 %437  ;;  %v446_v26 = vpop.permute.xlu0 %445 }
  0x9d   : > { %476 = vmatprep.subr.bf16.mxu0 %v446_v26  ;;  %v448_v27 = vsel %vm447_vm4, %v444_v24, %v446_v26  ;;  %v440_v30 = vsel %vm439_vm5, %v436_v23, %v438_v25 }
  0x9e   : > { %477 = vmatpush1.bf16.msra.mxu0 %v448_v27 }
  0x9f   : > { %478 = vmatprep.subr.bf16.mxu0 %v438_v25 }
  0xa0   : > { %v430_v28 = vpop.permute.xlu1 %429  ;;  %v428_v29 = vpop.permute.xlu0 %427 }
  0xa1   : > { %v432_v31 = vsel %vm431_vm6, %v428_v29, %v430_v28 }
  0xa2   : > { %479 = vmatpush1.bf16.msra.mxu0 %v440_v30 }
  0xa3   : > { %480 = vmatprep.subr.bf16.mxu0 %v430_v28 }
  0xa4   : > { %v422_v32 = vpop.permute.xlu1 %421  ;;  %v420_v33 = vpop.permute.xlu0 %419 }
  0xa5   : > { %v424_v34 = vsel %vm423_vm7, %v420_v33, %v422_v32 }
  0xa6   : > { %481 = vmatpush1.bf16.msra.mxu0 %v432_v31 }
  0xa7   : > { %482 = vmatprep.subr.bf16.mxu0 %v422_v32 }
  0xa8   : > { %v414_v35 = vpop.permute.xlu1 %413  ;;  %v412_v36 = vpop.permute.xlu0 %411 }
  0xa9   : > { %v416_v37 = vsel %vm415_vm8, %v412_v36, %v414_v35 }
  0xaa   : > { %483 = vmatpush1.bf16.msra.mxu0 %v424_v34 }
  0xab   : > { %484 = vmatprep.subr.bf16.mxu0 %v414_v35 }
  0xac   : > { %v406_v38 = vpop.permute.xlu1 %405  ;;  %v404_v39 = vpop.permute.xlu0 %403 }
  0xad   : > { %v408_v40 = vsel %vm407_vm9, %v404_v39, %v406_v38 }
  0xae   : > { %485 = vmatpush1.bf16.msra.mxu0 %v416_v37 }
  0xaf   : > { %486 = vmatprep.subr.bf16.mxu0 %v406_v38 }
  0xb2   : > { %487 = vmatpush1.bf16.msra.mxu0 %v408_v40 }
  0xb3   : > { %488 = vmatprep.subr.bf16.mxu0 %v1047_v17 }
  0xb6   : > { %489 = vmatpush1.bf16.msra.mxu0 %v1041_v14 }
  0xb9   : > { %799 = vmatmul.mubr.msk.bf16.vlgmr.msra.gmra.mxu0 %vm470_vm10, %v885_v41  ;;  %v458_v45 = vpop.permute.xlu0 %457  ;;  %v463_v50 = vpop.permute.xlu1 %462 }
  0xbd   : > { %v588_v62 = vpop.permute.xlu0 %587 }
  0xc1   : > { %v582_v63 = vpop.permute.xlu0 %581 }
  0xc5   : > { %v576_v2 = vpop.permute.xlu0 %575 }
  0xc9   : > { %v570_v7 = vpop.permute.xlu0 %569 }
  0xcd   : > { %v564_v10 = vpop.permute.xlu0 %563 }
  0xd1   : > { %v558_v13 = vpop.permute.xlu0 %557 }
  0xd5   : > { %v603_v17 = vpop.permute.xlu0 %602 }
  0xd9   : > { %v661_v20 = vpop.permute.xlu0 %660 }
  0xdd   : > { %v665_v25 = vpop.permute.xlu0 %664 }
 0x179   : > { %v508_v46 = vpop.f32.mrf.mxu0 }
 0x17a   : > { %v509_v48 = vadd.f32 %v508_v46, %v458_v45 }
 0x17b   : > { %v510_v49 = vpop.f32.mrf.mxu0 }
 0x17c   : > { %v535_v51 = vsel %vm529_vm13, %v509_v48, 0.0 }
 0x17d   : > { %v512_v52 = vpop.f32.mrf.mxu0  ;;  %v543_v54 = vmul.f32 0.1, %v535_v51  ;;  %vm539_vm14 = vcmp.ge.f32.partialorder %v535_v51, 0.0 }
 0x17e   : > { %v513_v53 = vadd.f32 %v512_v52, %v463_v50 }
 0x17f   : > { %v514_v55 = vpop.f32.mrf.mxu0  ;;  %v547_v58 = vsel %vm539_vm14, %v535_v51, %v543_v54 }
 0x180   : > { %v537_v56 = vsel %vm529_vm13, %v513_v53, 0.0 }
 0x181   : > { %vm541_vm15 = vcmp.ge.f32.partialorder %v537_v56, 0.0  ;;  %v545_v57 = vmul.f32 0.1, %v537_v56 }
 0x183   : > { %v549_v59 = vsel %vm541_vm15, %v537_v56, %v545_v57 }
 0x184   : > { %v551_v60 = vpack.c.bf16 %v549_v59, %v547_v58 }
 0x186   : > { %585 = vrot.lane.b32.xlu1 %v551_v60, %s928_s8 }
 0x18a   : > { %579 = vrot.lane.b32.xlu1 %v551_v60, %s927_s21  ;;  %s806_s21 = sshll.u32 %s1158_s23, 4 }
 0x18e   : > { %573 = vrot.lane.b32.xlu1 %v551_v60, %s929_s9 }
 0x192   : > { %567 = vrot.lane.b32.xlu1 %v551_v60, %s930_s10  ;;  %s381_s10 = scalar_lea.vmem %s1149_s6, %s806_s21 }
 0x196   : > { %561 = vrot.lane.b32.xlu1 %v551_v60, %s931_s11 }
 0x19a   : > { %555 = vrot.lane.b32.xlu1 %v551_v60, %s933_s12 }
 0x19e   : > { %597 = vperm.xlu1 %884, %v593_v61  }
 0x1a2   : > { %658 = vrot.lane.b32.xlu1 %v1031_v4, %s928_s8 }
 0x1a6   : > { %662 = vrot.lane.b32.xlu1 %v1033_v5, %s928_s8 }
 0x1f8   : > { %v586_v0 = vpop.permute.xlu1 %585 }
 0x1f9   : > { %v589_v1 = vsel %vm447_vm4, %v586_v0, %v588_v62 }
 0x1fa   : > { %816 = vmatpush3.bf16.msra.mxu1 %v589_v1 }
 0x1fb   : > { %817 = vmatprep.subr.bf16.mxu1 %v935_v47 }
 0x1fc   : > { %v580_v3 = vpop.permute.xlu1 %579 }
 0x1fd   : > { %v583_v6 = vsel %vm439_vm5, %v580_v3, %v582_v63 }
 0x1fe   : > { %818 = vmatpush3.bf16.msra.mxu1 %v583_v6 }
 0x1ff   : > { %819 = vmatprep.subr.bf16.mxu1 %v935_v47 }
 0x200   : > { %v574_v8 = vpop.permute.xlu1 %573 }
 0x201   : > { %v577_v4 = vsel %vm431_vm6, %v574_v8, %v576_v2 }
 0x202   : > { %820 = vmatpush3.bf16.msra.mxu1 %v577_v4 }
 0x203   : > { %821 = vmatprep.subr.bf16.mxu1 %v935_v47 }
 0x204   : > { %v568_v5 = vpop.permute.xlu1 %567 }
 0x205   : > { %v571_v9 = vsel %vm423_vm7, %v568_v5, %v570_v7 }
 0x206   : > { %822 = vmatpush3.bf16.msra.mxu1 %v571_v9 }
 0x207   : > { %823 = vmatprep.subr.bf16.mxu1 %v935_v47 }
 0x208   : > { %v562_v11 = vpop.permute.xlu1 %561 }
 0x209   : > { %v565_v12 = vsel %vm415_vm8, %v562_v11, %v564_v10 }
 0x20a   : > { %824 = vmatpush3.bf16.msra.mxu1 %v565_v12 }
 0x20b   : > { %825 = vmatprep.subr.bf16.mxu1 %v935_v47 }
 0x20c   : > { %v556_v14 = vpop.permute.xlu1 %555 }
 0x20d   : > { %v559_v15 = vsel %vm407_vm9, %v556_v14, %v558_v13 }
 0x20e   : > { %826 = vmatpush3.bf16.msra.mxu1 %v559_v15 }
 0x20f   : > { %827 = vmatprep.subr.bf16.mxu1 %v935_v47 }
 0x212   : > { %828 = vmatpush3.bf16.msra.mxu1 %v551_v60 }
 0x215   : > { %830 = vmatmul.mubr.msk.bf16.vlgmr.msra.gmra.mxu1 %vm470_vm10, %v886_v16 }
 0x219   : > { %v598_v18 = vpop.permute.xlu1 %597 }
 0x21d   : > { %v659_v19 = vpop.permute.xlu1 %658 }
 0x21e   : > { %v667_v22 = vsel %vm447_vm4, %v659_v19, %v661_v20 }
 0x221   : > { %v663_v24 = vpop.permute.xlu1 %662 }
 0x222   : > { %v668_v29 = vsel %vm447_vm4, %v663_v24, %v665_v25 }
 0x2d5   : > { %v647_v21 = vpop.f32.mrf.mxu1 }
 0x2d6   : > { %v648_v23 = vadd.f32 %v647_v21, %v598_v18 }
 0x2d7   : > { %v831_v26 = vpop.f32.mrf.mxu1 }
 0x2d8   : > { %v671_v27 = vadd.f32 %v667_v22, %v648_v23 }
 0x2d9   : > { %v650_v28 = vpop.f32.mrf.mxu1 }
 0x2da   : > { %673 = vst [vmem:[%s381_s10] sm:$0xff] %v671_v27  ;;  %v651_v30 = vadd.f32 %v650_v28, %v603_v17 }
 0x2db   : > { %v832_v31 = vpop.f32.mrf.mxu1 }
 0x2dc   : > { %v672_v32 = vadd.f32 %v668_v29, %v651_v30 }
 0x2de   : > { %674 = vst [vmem:[%s381_s10 + $0x8] sm:$0xff] %v672_v32 }
 0x2df PF: > { %s16_s25 = sadd.s32 1, %s925_s25   ;;  %s1151_s21 = smov %s913_s22 }
 0x2e0   : > { %p13_p10 = scmp.ge.s32.totalorder %s16_s25, 4   ;;  %s1152_s22 = smov %s1011_s30 }
 0x2e1   : > { %s1153_s23 = smov %s921_s24  ;;  %s1154_s24 = smov %s1156_s26 }
 0x2e2   :  { %15 = sbr.rel (!%p13_p10) target bundleno = 3 (0x3), region = 163 }

// kernel: forward.9
= control target key start
LH: loop header
LB: loop body
LE: loop exit
PB: predicated region body
PF: predicated region fallthrough
CT: control target
= control target key end

     0   :  { %12 = vsyncpa [#allocation5], 0  ;;  %s1361_s0 = inlined_call_operand.vmem [shape: f32[2,16,256], index: 0, kind: input, shape index: {}, may-alias: {0,1}]   ;;  %s1362_s1 = inlined_call_operand.vmem [shape: f32[2,16,256], index: 1, kind: input, shape index: {}, may-alias: {0,1}]   ;;  %s1363_s2 = inlined_call_operand.vmem [shape: bf16[16,112], index: 2, kind: input, shape index: {}]   ;;  %s1364_s3 = inlined_call_operand.vmem [shape: f32[16,1], index: 3, kind: input, shape index: {}]   ;;  %s1365_s4 = inlined_call_operand.vmem [shape: bf16[16,112], index: 4, kind: input, shape index: {}]   ;;  %s1366_s5 = inlined_call_operand.vmem [shape: f32[16,1], index: 5, kind: input, shape index: {}]   ;;  %s1367_s6 = inlined_call_operand.vmem [shape: f32[2,16,128], index: 6, kind: input, shape index: {}]   ;;  %s1368_s7 = inlined_call_operand.hbm [shape: f32[2,16,128], index: 7, kind: output, shape index: {}]  }
   0x1   :  { %14 = vsyncpa [#allocation5 + $0x1], 0  ;;  %s1136_s24 = smov 0   ;;  %s1138_s25 = smov 0  }
   0x2   :  { %s1140_s26 = smov 0   ;;  %s1142_s27 = smov 0  }
   0x3   :  { %s1144_s28 = smov 0   ;;  %s1146_s29 = smov 0  }
   0x4 LB: > { %s869_s30 = sadd.s32 4294967295, %s1077_s29   ;;  %s870_s8 = sadd.s32 4294967294, %s1077_s29   ;;  %s1077_s29 = sphi %s1146_s29, %s20_s29   ;;  %s1073_s28 = sphi %s1144_s28, %s1376_s28   ;;  %s1069_s27 = sphi %s1142_s27, %s1375_s27   ;;  %s1065_s26 = sphi %s1140_s26, %s1374_s26   ;;  %s1061_s25 = sphi %s1138_s25, %s1373_s25   ;;  %s1057_s24 = sphi %s1136_s24, %s1372_s24  }
   0x5   : > { %s32_s9 = sadd.s32 1, %s1073_s28  ;;  %s41_s10 = sadd.s32 1, %s1065_s26 }
   0x6   : > { %p34_p0 = scmp.ge.s32.totalorder %s32_s9, 2  ;;  %p48_p1 = scmp.ne.s32.totalorder %s1065_s26, %s1061_s25 }
   0x7   : > { %p49_p2 = scmp.eq.s32.totalorder %s1077_s29, 0  ;;  %p222_p3 = scmp.eq.s32.totalorder %s869_s30, 1 }
   0x8   : > { %s1378_s9 = smov (%p34_p0, %s32_s9), 0  ;;  %p227_p6 = scmp.ne.s32.totalorder %s1061_s25, %s1057_s24 }
   0x9   : > { %p1175_p4 = por %p49_p2, %p48_p1  ;;  %p1179_p5 = por %p222_p3, %p48_p1 }
   0xa   : > { %s36_s13 = ssub.s32 %s1073_s28, %s1378_s9  ;;  %p228_p8 = scmp.eq.s32.totalorder %s870_s8, 1 }
   0xb   : > { %p39_p7 = scmp.eq.s32.totalorder %s36_s13, 0  ;;  %p872_p10 = scmp.ge.s32.totalorder %s1077_s29, 2 }
   0xc   : > { %p1190_p9 = por %p228_p8, %p227_p6 }
   0xd   : > { %s1188_s14 = scalar_select %p39_p7, %s1065_s26, %s41_s10  }
   0xe   : > { %256 = sbr.rel (%p872_p10) target bundleno = 29 (0x1d), region = 32 }
  0x13   : > { %259 = sbr.rel (!%p1175_p4) target bundleno = 24 (0x18), region = 36  ;;  %s261_s16 = sand.u32 (%p1175_p4), 1, %s1065_s26  }
  0x14   : > { %s896_s17 = sshll.u32 (%p1175_p4), %s1073_s28, 5  ;;  %s873_s18 = sshll.u32 (%p1175_p4), %s261_s16, 4 }
  0x15   : > { %s267_s21 = scalar_lea.vmem (%p1175_p4), %s1361_s0, %s896_s17  ;;  %s263_s22 = scalar_lea.vmem (%p1175_p4), [#allocation2], %s873_s18 }
  0x16   : > { %v298_v0 = vld [vmem:[%s267_s21] sm:$0xff] (%p1175_p4)  ;;  %v300_v1 = vld [vmem:[%s267_s21 + $0x10] sm:$0xff] (%p1175_p4) }
  0x17   : > { %299 = vst [vmem:[%s263_s22] sm:$0xff] (%p1175_p4), %v298_v0  ;;  %301 = vst [vmem:[%s263_s22 + $0x8] sm:$0xff] (%p1175_p4), %v300_v1 }
  0x18 PF: > { %307 = sbr.rel (!%p1175_p4) target bundleno = 29 (0x1d), region = 74  ;;  %s309_s23 = sand.u32 (%p1175_p4), 1, %s1065_s26  }
  0x19   : > { %s897_s30 = sshll.u32 (%p1175_p4), %s1073_s28, 5  ;;  %s876_s8 = sshll.u32 (%p1175_p4), %s309_s23, 4 }
  0x1a   : > { %s785_s16 = scalar_lea.vmem (%p1175_p4), %s1362_s1, %s897_s30  ;;  %s311_s17 = scalar_lea.vmem (%p1175_p4), [#allocation3], %s876_s8 }
  0x1b   : > { %v879_v2 = vld [vmem:[%s785_s16 + $0x8] sm:$0xff] (%p1175_p4)  ;;  %v880_v3 = vld [vmem:[%s785_s16 + $0x18] sm:$0xff] (%p1175_p4) }
  0x1c   : > { %348 = vst [vmem:[%s311_s17] sm:$0xff] (%p1175_p4), %v879_v2  ;;  %350 = vst [vmem:[%s311_s17 + $0x8] sm:$0xff] (%p1175_p4), %v880_v3 }
  0x1d PF: > { %p881_p11 = scmp.ge.s32.totalorder %s1077_s29, 1  ;;  %p366_p12 = scmp.lt.s32.totalorder %s1077_s29, 3 }
  0x1f   : > { %p367_p13 = pnand %p881_p11, %p366_p12 }
  0x20   : > { %s373_s11 = sand.u32 (!%p367_p13), 1, %s1061_s25   ;;  %s1079_s21 = smov (!%p367_p13), 113  }
  0x21   : > { %370 = sbr.rel (%p367_p13) target bundleno = 759 (0x2f7), region = 116  ;;  %s1216_s18 = sshll.u32 (!%p367_p13), %s373_s11, 4 }
  0x22   : > { %s375_s19 = scalar_lea.vmem (!%p367_p13), [#allocation2], %s1216_s18  ;;  %s382_s20 = scalar_lea.vmem (!%p367_p13), [#allocation3], %s1216_s18 }
  0x23   : > { %s1080_s22 = smov (!%p367_p13), 110   ;;  %s1081_s23 = smov (!%p367_p13), 116  }
  0x24   : > { %s1082_s30 = smov (!%p367_p13), 119   ;;  %s1083_s8 = smov (!%p367_p13), 122  }
  0x25   : > { %s1085_s10 = smov (!%p367_p13), 125   ;;  %p424_p0 = scmp.lt.s32.totalorder (!%p367_p13), %s1069_s27, 1 }
  0x26   : > { %v1219_v4 = vld [vmem:[%s375_s19] sm:$0xff]  ;;  %v1221_v5 = vld [vmem:[%s375_s19 + $0x8] sm:$0xff]  ;;  %v1084_v18 = vmov 0   ;;  %v1086_v21 = vmov 0.0|0.0   ;;  %vm497_vm4 = vcmask 900096   ;;  %vm489_vm5 = vcmask 924672  }
  0x27   : > { %v435_v6 = vld [vmem:[%s382_s20] sm:$0xff]  ;;  %vm437_vm0 = vcmp.ge.f32.partialorder %v1219_v4, 0.0  ;;  %vm439_vm1 = vcmp.ge.f32.partialorder %v1221_v5, 0.0  ;;  %v441_v7 = vmul.f32 0.1, %v1219_v4  ;;  %v436_v9 = vld [vmem:[%s382_s20 + $0x8] sm:$0xff]  ;;  %556 = vmatprep.mubr.bf16.mxu0 %v1084_v18  ;;  %997 = vset.pattern.permute.xlu0 %v1084_v18  ;;  %v569_v42 = vlaneseq }
  0x28   : > { %v443_v8 = vmul.f32 0.1, %v1221_v5  ;;  %vm438_vm2 = vcmp.ge.f32.partialorder %v435_v6, 0.0  ;;  %v442_v10 = vmul.f32 0.1, %v435_v6  ;;  %vm440_vm3 = vcmp.ge.f32.partialorder %v436_v9, 0.0  ;;  %998 = vset.pattern.permute.xlu1 %v1084_v18 }
  0x29   : > { %v445_v11 = vsel %vm437_vm0, %v1219_v4, %v441_v7  ;;  %v444_v13 = vmul.f32 0.1, %v436_v9  ;;  %v503_v19 = vld [vmem:[%s1364_s3] sm:$0xff]  ;;  %v504_v20 = vld [vmem:[%s1364_s3 + $0x8] sm:$0xff]  ;;  %s1087_s20 = smov 123   ;;  %vm481_vm6 = vcmask 949248  }
  0x2a   : > { %v447_v12 = vsel %vm439_vm1, %v1221_v5, %v443_v8  ;;  %v446_v15 = vsel %vm438_vm2, %v435_v6, %v442_v10  ;;  %v648_v22 = vld [vmem:[%s1366_s5 + $0x8] sm:$0xff]  ;;  %vm473_vm7 = vcmask 973824   ;;  %vm465_vm8 = vcmask 998400   ;;  %v999_v41 = vld [vmem:[%s1363_s2] sm:$0xff]   ;;  %s422_s17 = scalar_lea.vmem [#allocation4], %s1216_s18  ;;  %s899_s13 = sshll.u32 %s1069_s27, 8 }
  0x2b   : > { %v1230_v14 = vpack.c.bf16 %v447_v12, %v445_v11  ;;  %v448_v16 = vsel %vm440_vm3, %v436_v9, %v444_v13  ;;  %vm457_vm9 = vcmask 1022976   ;;  %vm520_vm10 = vcmask 916480   ;;  %v647_v61 = vld [vmem:[%s1366_s5] sm:$0xff]  ;;  %s750_s19 = sshll.u32 %s422_s17, 4  ;;  %s1315_s18 = scalar_lea.sflag [#allocation5], %s373_s11  ;;  %s1311_s19 = int_to_ptr.vmem [resolvable:$true] %s750_s19 }
  0x2c   : > { %v1234_v17 = vpack.c.bf16 %v448_v16, %v446_v15  ;;  %v570_v43 = vand.u32 127, %v569_v42  ;;  %v1091_v47 = vmov 0.0   ;;  %vm1092_vm0 = vmmov 0   ;;  %v1000_v16 = vld [vmem:[%s1365_s4] sm:$0xff]  }
  0x2d   : > { %485 = vrot.lane.b32.xlu1 %v1230_v14, %s1079_s21  ;;  %493 = vrot.lane.b32.xlu0 %v1230_v14, %s1080_s22  ;;  %vm636_vm1 = vcmask 1006592   ;;  %vm629_vm2 = vcmask 1014784   ;;  %vm616_vm3 = vcmask 1031168  }
  0x2e   : > { %v573_v44 = vadd.s32 4294967293, %v570_v43  ;;  %908 = vmatprep.subr.bf16.mxu1 %v1091_v47  ;;  %922 = vmatprep.mubr.msk.bf16.mxu1 %vm1092_vm0, %v1091_v47 }
  0x30   : > { %vm575_vm11 = vcmp.ge.s32.totalorder %v573_v44, 0  ;;  %vm577_vm12 = vcmp.lt.s32.totalorder %v573_v44, 32 }
  0x31   : > { %487 = vrot.lane.b32.xlu1 %v1234_v17, %s1079_s21  ;;  %495 = vrot.lane.b32.xlu0 %v1234_v17, %s1080_s22  ;;  %s1088_s21 = smov 124   ;;  %s1089_s22 = smov 126   ;;  %vm579_vm13 = vmand %vm575_vm11, %vm577_vm12 }
  0x35   : > { %479 = vrot.lane.b32.xlu1 %v1234_v17, %s1081_s23  ;;  %477 = vrot.lane.b32.xlu0 %v1230_v14, %s1081_s23 }
  0x39   : > { %471 = vrot.lane.b32.xlu1 %v1234_v17, %s1082_s30  ;;  %469 = vrot.lane.b32.xlu0 %v1230_v14, %s1082_s30  ;;  %s1090_s30 = smov 127  }
  0x3d   : > { %463 = vrot.lane.b32.xlu1 %v1234_v17, %s1083_s8  ;;  %461 = vrot.lane.b32.xlu0 %v1230_v14, %s1083_s8 }
  0x41   : > { %455 = vrot.lane.b32.xlu1 %v1234_v17, %s1085_s10  ;;  %453 = vrot.lane.b32.xlu0 %v1230_v14, %s1085_s10 }
  0x45   : > { %507 = vperm.xlu0 %997, %v503_v19   ;;  %512 = vperm.xlu1 %998, %v504_v20  }
  0x49   : > { %641 = vrot.lane.b32.xlu0 %v1086_v21, %s1083_s8 }
  0x4d   : > { %634 = vrot.lane.b32.xlu0 %v1086_v21, %s1087_s20 }
  0x51   : > { %627 = vrot.lane.b32.xlu0 %v1086_v21, %s1088_s21 }
  0x55   : > { %621 = vrot.lane.b32.xlu0 %v1086_v21, %s1085_s10 }
  0x59   : > { %614 = vrot.lane.b32.xlu0 %v1086_v21, %s1089_s22 }
  0x5d   : > { %607 = vrot.lane.b32.xlu0 %v1086_v21, %s1090_s30 }
  0x61   : > { %656 = vperm.xlu0 %997, %v648_v22  }
  0x65   : > { %714 = vrot.lane.b32.xlu0 %v435_v6, %s1081_s23 }
  0x69   : > { %718 = vrot.lane.b32.xlu0 %v436_v9, %s1081_s23 }
  0x9f   : > { %v486_v23 = vpop.permute.xlu1 %485  ;;  %v494_v24 = vpop.permute.xlu0 %493 }
  0xa3   : > { %v488_v25 = vpop.permute.xlu1 %487  ;;  %v496_v26 = vpop.permute.xlu0 %495 }
  0xa4   : > { %526 = vmatprep.subr.bf16.mxu0 %v496_v26  ;;  %v498_v27 = vsel %vm497_vm4, %v494_v24, %v496_v26  ;;  %v490_v30 = vsel %vm489_vm5, %v486_v23, %v488_v25  ;;  %vm609_vm4 = vcmask 1039360  }
  0xa5   : > { %527 = vmatpush1.bf16.msra.mxu0 %v498_v27 }
  0xa6   : > { %528 = vmatprep.subr.bf16.mxu0 %v488_v25 }
  0xa7   : > { %v480_v28 = vpop.permute.xlu1 %479  ;;  %v478_v29 = vpop.permute.xlu0 %477 }
  0xa8   : > { %v482_v31 = vsel %vm481_vm6, %v478_v29, %v480_v28 }
  0xa9   : > { %529 = vmatpush1.bf16.msra.mxu0 %v490_v30 }
  0xaa   : > { %530 = vmatprep.subr.bf16.mxu0 %v480_v28 }
  0xab   : > { %v472_v32 = vpop.permute.xlu1 %471  ;;  %v470_v33 = vpop.permute.xlu0 %469 }
  0xac   : > { %v474_v34 = vsel %vm473_vm7, %v470_v33, %v472_v32 }
  0xad   : > { %531 = vmatpush1.bf16.msra.mxu0 %v482_v31 }
  0xae   : > { %532 = vmatprep.subr.bf16.mxu0 %v472_v32 }
  0xaf   : > { %v464_v35 = vpop.permute.xlu1 %463  ;;  %v462_v36 = vpop.permute.xlu0 %461 }
  0xb0   : > { %v466_v37 = vsel %vm465_vm8, %v462_v36, %v464_v35 }
  0xb1   : > { %533 = vmatpush1.bf16.msra.mxu0 %v474_v34 }
  0xb2   : > { %534 = vmatprep.subr.bf16.mxu0 %v464_v35 }
  0xb3   : > { %v456_v38 = vpop.permute.xlu1 %455  ;;  %v454_v39 = vpop.permute.xlu0 %453 }
  0xb4   : > { %v458_v40 = vsel %vm457_vm9, %v454_v39, %v456_v38 }
  0xb5   : > { %535 = vmatpush1.bf16.msra.mxu0 %v466_v37 }
  0xb6   : > { %536 = vmatprep.subr.bf16.mxu0 %v456_v38 }
  0xb9   : > { %537 = vmatpush1.bf16.msra.mxu0 %v458_v40 }
  0xba   : > { %538 = vmatprep.subr.bf16.mxu0 %v1234_v17 }
  0xbd   : > { %539 = vmatpush1.bf16.msra.mxu0 %v1230_v14 }
  0xc0   : > { %888 = vmatmul.mubr.msk.bf16.vlgmr.msra.gmra.mxu0 %vm520_vm10, %v999_v41  ;;  %v508_v45 = vpop.permute.xlu0 %507  ;;  %v513_v50 = vpop.permute.xlu1 %512 }
  0xc4   : > { %v642_v62 = vpop.permute.xlu0 %641 }
  0xc8   : > { %v635_v63 = vpop.permute.xlu0 %634 }
  0xcc   : > { %v628_v2 = vpop.permute.xlu0 %627 }
  0xd0   : > { %v622_v7 = vpop.permute.xlu0 %621 }
  0xd4   : > { %v615_v10 = vpop.permute.xlu0 %614 }
  0xd8   : > { %v608_v13 = vpop.permute.xlu0 %607 }
  0xdc   : > { %v657_v17 = vpop.permute.xlu0 %656 }
  0xe0   : > { %v715_v20 = vpop.permute.xlu0 %714 }
  0xe4   : > { %v719_v25 = vpop.permute.xlu0 %718 }
 0x180   : > { %v558_v46 = vpop.f32.mrf.mxu0 }
 0x181   : > { %v559_v48 = vadd.f32 %v558_v46, %v508_v45 }
 0x182   : > { %v560_v49 = vpop.f32.mrf.mxu0 }
 0x183   : > { %v585_v51 = vsel %vm579_vm13, %v559_v48, 0.0 }
 0x184   : > { %v562_v52 = vpop.f32.mrf.mxu0  ;;  %v593_v54 = vmul.f32 0.1, %v585_v51  ;;  %vm589_vm14 = vcmp.ge.f32.partialorder %v585_v51, 0.0 }
 0x185   : > { %v563_v53 = vadd.f32 %v562_v52, %v513_v50 }
 0x186   : > { %v564_v55 = vpop.f32.mrf.mxu0  ;;  %v597_v58 = vsel %vm589_vm14, %v585_v51, %v593_v54 }
 0x187   : > { %v587_v56 = vsel %vm579_vm13, %v563_v53, 0.0 }
 0x188   : > { %vm591_vm15 = vcmp.ge.f32.partialorder %v587_v56, 0.0  ;;  %v595_v57 = vmul.f32 0.1, %v587_v56 }
 0x18a   : > { %v599_v59 = vsel %vm591_vm15, %v587_v56, %v595_v57 }
 0x18b   : > { %v601_v60 = vpack.c.bf16 %v599_v59, %v597_v58 }
 0x18d   : > { %639 = vrot.lane.b32.xlu1 %v601_v60, %s1083_s8  ;;  %s1309_s8 = scalar_lea.hbm %s1368_s7, %s899_s13 }
 0x191   : > { %632 = vrot.lane.b32.xlu1 %v601_v60, %s1087_s20 }
 0x195   : > { %625 = vrot.lane.b32.xlu1 %v601_v60, %s1088_s21 }
 0x199   : > { %619 = vrot.lane.b32.xlu1 %v601_v60, %s1085_s10  ;;  %s425_s10 = scalar_select %p424_p0, %s1069_s27, 1 }
 0x19a   : > { %s1093_s27 = smov [#allocation4]  }
 0x19b   : > { %s898_s20 = sshll.u32 %s425_s10, 4  ;;  %s1001_s10 = scalar_lea.vmem %s1311_s19, 256 }
 0x19c   : > { %p1002_p1 = scmp.ne.s32.totalorder %s1311_s19, %s1001_s10 }
 0x19d   : > { %612 = vrot.lane.b32.xlu1 %v601_v60, %s1089_s22 }
 0x19e   : > { %p1003_p2 = pnand %p1002_p1, %p1179_p5 }
 0x1a0   : > { %p1004_p3 = pneg %p1003_p2 }
 0x1a1   : > { %605 = vrot.lane.b32.xlu1 %v601_v60, %s1090_s30  ;;  %s431_s30 = scalar_lea.vmem %s1367_s6, %s898_s20  ;;  %s1005_s20 = sshll.u32 %s1093_s27, 4  ;;  %s1006_s20 = int_to_ptr.vmem [resolvable:$false] %s1005_s20 }
 0x1a2   : > { %v727_v26 = vld [vmem:[%s431_s30] sm:$0xff]  ;;  %v728_v33 = vld [vmem:[%s431_s30 + $0x8] sm:$0xff]  ;;  %s1007_s21 = scalar_lea.vmem %s1006_s20, 512  ;;  %p1008_p4 = scmp.lt.s32.totalorder %s1311_s19, %s1006_s20 }
 0x1a3   : > { %p1009_p6 = scmp.lt.s32.totalorder %s1007_s21, %s1001_s10 }
 0x1a5   : > { %651 = vperm.xlu1 %998, %v647_v61   ;;  %p1010_p7 = por %p1009_p6, %p1008_p4 }
 0x1a7   : > { %p1011_p8 = pnand %p1010_p7, %p1004_p3 }
 0x1a9   : > { %712 = vrot.lane.b32.xlu1 %v1219_v4, %s1081_s23 }
 0x1ad   : > { %716 = vrot.lane.b32.xlu1 %v1221_v5, %s1081_s23 }
 0x1ff   : > { %v640_v0 = vpop.permute.xlu1 %639 }
 0x200   : > { %v643_v1 = vsel %vm465_vm8, %v640_v0, %v642_v62 }
 0x201   : > { %909 = vmatpush3.bf16.msra.mxu1 %v643_v1 }
 0x202   : > { %910 = vmatprep.subr.bf16.mxu1 %v1091_v47 }
 0x203   : > { %v633_v3 = vpop.permute.xlu1 %632 }
 0x204   : > { %v637_v6 = vsel %vm636_vm1, %v633_v3, %v635_v63 }
 0x205   : > { %911 = vmatpush3.bf16.msra.mxu1 %v637_v6 }
 0x206   : > { %912 = vmatprep.subr.bf16.mxu1 %v1091_v47 }
 0x207   : > { %v626_v8 = vpop.permute.xlu1 %625 }
 0x208   : > { %v630_v4 = vsel %vm629_vm2, %v626_v8, %v628_v2 }
 0x209   : > { %913 = vmatpush3.bf16.msra.mxu1 %v630_v4 }
 0x20a   : > { %914 = vmatprep.subr.bf16.mxu1 %v1091_v47 }
 0x20b   : > { %v620_v5 = vpop.permute.xlu1 %619 }
 0x20c   : > { %v623_v9 = vsel %vm457_vm9, %v620_v5, %v622_v7 }
 0x20d   : > { %915 = vmatpush3.bf16.msra.mxu1 %v623_v9 }
 0x20e   : > { %916 = vmatprep.subr.bf16.mxu1 %v1091_v47 }
 0x20f   : > { %v613_v11 = vpop.permute.xlu1 %612 }
 0x210   : > { %v617_v12 = vsel %vm616_vm3, %v613_v11, %v615_v10 }
 0x211   : > { %917 = vmatpush3.bf16.msra.mxu1 %v617_v12 }
 0x212   : > { %918 = vmatprep.subr.bf16.mxu1 %v1091_v47 }
 0x213   : > { %v606_v14 = vpop.permute.xlu1 %605 }
 0x214   : > { %v610_v15 = vsel %vm609_vm4, %v606_v14, %v608_v13 }
 0x215   : > { %919 = vmatpush3.bf16.msra.mxu1 %v610_v15 }
 0x216   : > { %920 = vmatprep.subr.bf16.mxu1 %v1091_v47 }
 0x219   : > { %921 = vmatpush3.bf16.msra.mxu1 %v601_v60 }
 0x21c   : > { %923 = vmatmul.mubr.msk.bf16.vlgmr.msra.gmra.mxu1 %vm520_vm10, %v1000_v16 }
 0x220   : > { %v652_v18 = vpop.permute.xlu1 %651 }
 0x224   : > { %v713_v19 = vpop.permute.xlu1 %712 }
 0x225   : > { %v721_v22 = vsel %vm481_vm6, %v713_v19, %v715_v20 }
 0x228   : > { %v717_v24 = vpop.permute.xlu1 %716 }
 0x229   : > { %v722_v30 = vsel %vm481_vm6, %v717_v24, %v719_v25 }
 0x2dc   : > { %v701_v21 = vpop.f32.mrf.mxu1 }
 0x2dd   : > { %v702_v23 = vadd.f32 %v701_v21, %v652_v18 }
 0x2de   : > { %v924_v27 = vpop.f32.mrf.mxu1 }
 0x2df   : > { %v725_v28 = vadd.f32 %v721_v22, %v702_v23 }
 0x2e0   : > { %v704_v29 = vpop.f32.mrf.mxu1 }
 0x2e1   : > { %v729_v31 = vadd.f32 %v727_v26, %v725_v28  ;;  %v705_v32 = vadd.f32 %v704_v29, %v657_v17 }
 0x2e2   : > { %v925_v34 = vpop.f32.mrf.mxu1 }
 0x2e3   : > { %v731_v35 = vmul.f32 0.5, %v729_v31  ;;  %v726_v36 = vadd.f32 %v722_v30, %v705_v32 }
 0x2e5   : > { %733 = vst [vmem:[%s422_s17] sm:$0xff] %v731_v35  ;;  %v730_v37 = vadd.f32 %v728_v33, %v726_v36 }
 0x2e7   : > { %v732_v38 = vmul.f32 0.5, %v730_v37 }
 0x2e9   : > { %734 = vst [vmem:[%s422_s17 + $0x8] sm:$0xff] %v732_v38 }
 0x2ea   : > { %1014 = shalt.err (!%p1011_p8)
}
 0x2eb   : > { %s1015_s11 = scalar_lea.hbm %s1309_s8, 256  ;;  %s1019_s17 = scalar_lea.hbm %s1368_s7, 512 }
 0x2ec   : > { %p1016_p11 = scmp.ne.s32.totalorder %s1309_s8, %s1015_s11  ;;  %p1020_p0 = scmp.lt.s32.totalorder %s1309_s8, %s1368_s7 }
 0x2ed   : > { %p1021_p1 = scmp.lt.s32.totalorder %s1019_s17, %s1015_s11 }
 0x2ee   : > { %p1017_p12 = pnand %p1016_p11, %p1179_p5 }
 0x2ef   : > { %p1022_p2 = por %p1021_p1, %p1020_p0 }
 0x2f0   : > { %p1018_p13 = pneg %p1017_p12 }
 0x2f2   : > { %p1023_p3 = pnand %p1022_p2, %p1018_p13 }
 0x2f4   : > { %1026 = shalt.err (!%p1023_p3)
}
 0x2f5   : > { %s1094_s23 = smov 128   ;;  %s1095_s10 = smov 8  }
 0x2f6   : > { %926 = dma.vmem_to_hbm [thread:$0]  (%p1179_p5), %s1311_s19, 256, %s1309_s8, %s1315_s18, %s1094_s23, %s1094_s23, %s1095_s10  }
 0x2f7 PF: > { %s765_s27 = sand.u32 1, %s1057_s24   ;;  %p929_p4 = pnand %p872_p10, %p1190_p9 }
 0x2f8   : > { %s766_s20 = scalar_lea.sflag [#allocation5], %s765_s27 }
 0x2f9   : > { %p930_p6 = pneg %p929_p4 }
 0x2fb   : > { %1052 = dma.done.wait (%p930_p6), %s766_s20, 256  }
 0x2fc   : > { %1054 = vsyncadd (%p930_p6), %s766_s20, 4294967040  ;;  %s20_s29 = sadd.s32 1, %s1077_s29   ;;  %s1372_s24 = smov %s1061_s25 }
 0x2fd   : > { %p17_p7 = scmp.ge.s32.totalorder %s20_s29, 4   ;;  %s1373_s25 = smov %s1065_s26 }
 0x2fe   : > { %s1374_s26 = smov %s1188_s14  ;;  %s1375_s27 = smov %s1073_s28 }
 0x2ff   : > { %s1376_s28 = smov %s1378_s9  ;;  %19 = sbr.rel (!%p17_p7) target bundleno = 4 (0x4), region = 175 }
 0x304   :  { %771 = vsyncpa [#allocation5], 1 }
 0x305   :  { %773 = vsyncpa [#allocation5 + $0x1], 1 }

</bundles_post_ra>
